<compile_context>
chip_gen: v7x
topology: tpu7x:2x2x1
jax: 0.10.0
libtpu: 0.0.40
codegen_flags: <defaults>
</compile_context>

<pallas_src>
import functools

import jax
import jax.numpy as jnp
from jax.experimental import pallas as pl
from jax.experimental.pallas import tpu as pltpu


def _round_up(x, m):
    return (x + m - 1) // m * m


def _tsa_direct_kernel(xp_ref, w_ref, o_ref, *, H_out, W_out, stride):
    """Direct 3x3 conv with the 1x1 adapter pre-folded into the center tap.

    xp_ref: (1, Hp, Wp, C)        one spatially-padded NHWC image
    w_ref : (9, C, Pp)            tap-major weight (tap = 3*dy + dx), alpha in tap 4
    o_ref : (1, H_out*W_out, Pp)  lane-dense (Pp % 128 == 0) output slab
    """
    C = xp_ref.shape[-1]
    acc = None
    for dy in range(3):
        for dx in range(3):
            if stride == 1:
                tap = xp_ref[0, dy:dy + H_out, dx:dx + W_out, :]
            else:
                tap = xp_ref[0,
                             pl.ds(dy, H_out, stride=stride),
                             pl.ds(dx, W_out, stride=stride), :]
            tap = tap.reshape(H_out * W_out, C)
            part = jnp.dot(tap, w_ref[3 * dy + dx],
                           preferred_element_type=jnp.float32)
            acc = part if acc is None else acc + part
    o_ref[0] = acc.astype(o_ref.dtype)


def wide_conv_tsa_forward(x_nchw, conv_w, alpha, *, stride=1, compute_dtype=None):
    """x_nchw: (N, C, H, W); conv_w: (P, C, 3, 3); alpha: (P, C, 1, 1)."""
    N, C, H, W = x_nchw.shape
    P = conv_w.shape[0]
    kh = kw = 3
    pad = 1
    if compute_dtype is None:
        compute_dtype = x_nchw.dtype
    out_dtype = x_nchw.dtype

    H_out = (H + 2 * pad - kh) // stride + 1
    W_out = (W + 2 * pad - kw) // stride + 1
    M_img = H_out * W_out
    Pp = _round_up(P, 128)                       # lane-dense output channels

    # --- weight prep (f32): fold the 1x1 adapter into the center tap, pad P ---
    w_hw = jnp.transpose(conv_w, (2, 3, 1, 0)).astype(jnp.float32)   # (3, 3, C, P)
    a_mat = alpha[:, :, 0, 0].T.astype(jnp.float32)                  # (C, P)
    w_hw = w_hw.at[1, 1].add(a_mat)              # center tap == what the 1x1 conv reads
    if Pp != P:
        w_hw = jnp.pad(w_hw, ((0, 0), (0, 0), (0, 0), (0, Pp - P)))
    w_mat = w_hw.reshape(kh * kw, C, Pp).astype(compute_dtype)       # (9, C, Pp)

    # --- input: NCHW -> NHWC, spatial zero-pad, read ONCE (no im2col in HBM) ---
    x = jnp.transpose(x_nchw, (0, 2, 3, 1))
    xp = jnp.pad(x, ((0, 0), (pad, pad), (pad, pad), (0, 0))).astype(compute_dtype)
    Hp, Wp = H + 2 * pad, W + 2 * pad

    kernel = functools.partial(_tsa_direct_kernel,
                               H_out=H_out, W_out=W_out, stride=stride)

    # Advisory cost + explicit VMEM budget (2x double-buffered per-image tiles
    # + resident weight); only raise the scoped limit if we actually need it.
    bytes_in = xp.size * xp.dtype.itemsize
    bytes_w = w_mat.size * w_mat.dtype.itemsize
    bytes_out = N * M_img * Pp * out_dtype.itemsize
    cost = pl.CostEstimate(flops=2 * N * M_img * (kh * kw * C) * Pp,
                           transcendentals=0,
                           bytes_accessed=bytes_in + bytes_w + bytes_out)

    in_tile = Hp * Wp * C * xp.dtype.itemsize
    out_tile = M_img * Pp * out_dtype.itemsize
    vmem_need = 2 * (in_tile + out_tile) + bytes_w + (2 << 20)
    cp_kwargs = dict(dimension_semantics=("parallel",))
    if vmem_need > (32 << 20):
        cp_kwargs["vmem_limit_bytes"] = int(min(vmem_need, 100 << 20))

    out = pl.pallas_call(
        kernel,
        out_shape=jax.ShapeDtypeStruct((N, M_img, Pp), out_dtype),
        grid_spec=pltpu.PrefetchScalarGridSpec(
            num_scalar_prefetch=0,
            grid=(N,),                                        # one image per step
            in_specs=[
                pl.BlockSpec((1, Hp, Wp, C), lambda n: (n, 0, 0, 0)),   # padded image
                pl.BlockSpec((kh * kw, C, Pp), lambda n: (0, 0, 0)),    # resident weight
            ],
            out_specs=pl.BlockSpec((1, M_img, Pp), lambda n: (n, 0, 0)),
        ),
        compiler_params=pltpu.CompilerParams(**cp_kwargs),
        cost_estimate=cost,
    )(xp, w_mat)

    out = out[:, :, :P].reshape(N, H_out, W_out, P)
    return jnp.transpose(out, (0, 3, 1, 2))                   # back to NCHW


def _reference(x_nchw, conv_w, alpha, *, stride=1):
    x = jnp.transpose(x_nchw, (0, 2, 3, 1)).astype(jnp.float32)
    w3 = jnp.transpose(conv_w, (2, 3, 1, 0)).astype(jnp.float32)   # HWIO
    a1 = jnp.transpose(alpha, (2, 3, 1, 0)).astype(jnp.float32)
    dn = ("NHWC", "HWIO", "NHWC")
    y = jax.lax.conv_general_dilated(x, w3, (stride, stride), ((1, 1), (1, 1)),
                                     dimension_numbers=dn)
    y1 = jax.lax.conv_general_dilated(x, a1, (stride, stride), "VALID",
                                      dimension_numbers=dn)
    return jnp.transpose(y + y1, (0, 3, 1, 2))


if __name__ == "__main__":
    key = jax.random.PRNGKey(0)
    k1, k2, k3 = jax.random.split(key, 3)

    N, C, H, W = 2, 4, 16, 16
    planes = 8

    x = jax.random.normal(k1, (N, C, H, W), dtype=jnp.float32)
    conv_w = jax.random.normal(k2, (planes, C, 3, 3), dtype=jnp.float32) * 0.1
    # module init sets alpha = ones; add a small deterministic perturbation so the
    # adapter term is non-trivial to verify
    alpha = jnp.ones((planes, C, 1, 1), jnp.float32) + \
        0.01 * jax.random.normal(k3, (planes, C, 1, 1), dtype=jnp.float32)
    garm = jnp.ones((planes, C, 1, 1), jnp.float32)  # unused in forward (as in PyTorch)
    # TODO(synk): Dropout(p=0) is an identity in the reference forward; nothing to implement.

    # f32 path (matches PyTorch numerics) — strict check.
    out = wide_conv_tsa_forward(x, conv_w, alpha, stride=1)
    out = jax.block_until_ready(out)

    ref = _reference(x, conv_w, alpha, stride=1)
    assert out.shape == ref.shape == (N, planes, H, W)
    assert jnp.max(jnp.abs(out - ref)) < 1e-4

    # bf16-fed MXU path (operands in bf16, f32 accumulation) — looser tolerance.
    out_bf16 = wide_conv_tsa_forward(x, conv_w, alpha, stride=1,
                                     compute_dtype=jnp.bfloat16)
    out_bf16 = jax.block_until_ready(out_bf16)
    assert jnp.max(jnp.abs(out_bf16 - ref)) < 1e-1

    print("KERNEL_OK")
</pallas_src>

<mosaic_0001>
module attributes {stable_mosaic.version = 11 : i64} {
  func.func @_tsa_direct_kernel(%arg0: i32, %arg1: memref<1x18x18x4xf32, #tpu.memory_space<vmem>>, %arg2: memref<9x4x128xf32, #tpu.memory_space<vmem>>, %arg3: memref<1x256x128xf32, #tpu.memory_space<vmem>>) attributes {dimension_semantics = [#tpu.dimension_semantics<parallel>], iteration_bounds = array<i64: 2>, scalar_prefetch = 0 : i64, scratch_operands = 0 : i64, tpu.core_type = #tpu.core_type<tc>, window_params = [{transform_indices = @transform_0, window_bounds = array<i64: 1, 18, 18, 4>}, {pipeline_mode = #tpu.pipeline_mode<synchronous>, transform_indices = @transform_1, window_bounds = array<i64: 9, 4, 128>}, {transform_indices = @transform_2, window_bounds = array<i64: 1, 256, 128>}]} {
    %c0 = arith.constant 0 : index
    %c0_0 = arith.constant 0 : index
    %c0_1 = arith.constant 0 : index
    %c0_2 = arith.constant 0 : index
    %0 = vector.load %arg1[%c0, %c0_0, %c0_1, %c0_2] : memref<1x18x18x4xf32, #tpu.memory_space<vmem>>, vector<1x16x16x4xf32>
    %1 = vector.shape_cast %0 : vector<1x16x16x4xf32> to vector<16x16x4xf32>
    %2 = vector.shape_cast %1 : vector<16x16x4xf32> to vector<256x4xf32>
    %c0_3 = arith.constant 0 : index
    %c0_4 = arith.constant 0 : index
    %c0_5 = arith.constant 0 : index
    %3 = vector.load %arg2[%c0_3, %c0_4, %c0_5] : memref<9x4x128xf32, #tpu.memory_space<vmem>>, vector<1x4x128xf32>
    %4 = vector.shape_cast %3 : vector<1x4x128xf32> to vector<4x128xf32>
    %cst = arith.constant dense<0.000000e+00> : vector<256x128xf32>
    %5 = tpu.matmul %2, %4, %cst {dimension_numbers = #tpu.dot_dimension_numbers<[1], [0], [0], [1], [0, 0, 1, 1], [], []>} : vector<256x4xf32>, vector<4x128xf32>, vector<256x128xf32> -> vector<256x128xf32>
    %c0_6 = arith.constant 0 : index
    %c0_7 = arith.constant 0 : index
    %c1 = arith.constant 1 : index
    %c0_8 = arith.constant 0 : index
    %6 = vector.load %arg1[%c0_6, %c0_7, %c1, %c0_8] : memref<1x18x18x4xf32, #tpu.memory_space<vmem>>, vector<1x16x16x4xf32>
    %7 = vector.shape_cast %6 : vector<1x16x16x4xf32> to vector<16x16x4xf32>
    %8 = vector.shape_cast %7 : vector<16x16x4xf32> to vector<256x4xf32>
    %c1_9 = arith.constant 1 : index
    %c0_10 = arith.constant 0 : index
    %c0_11 = arith.constant 0 : index
    %9 = vector.load %arg2[%c1_9, %c0_10, %c0_11] : memref<9x4x128xf32, #tpu.memory_space<vmem>>, vector<1x4x128xf32>
    %10 = vector.shape_cast %9 : vector<1x4x128xf32> to vector<4x128xf32>
    %cst_12 = arith.constant dense<0.000000e+00> : vector<256x128xf32>
    %11 = tpu.matmul %8, %10, %cst_12 {dimension_numbers = #tpu.dot_dimension_numbers<[1], [0], [0], [1], [0, 0, 1, 1], [], []>} : vector<256x4xf32>, vector<4x128xf32>, vector<256x128xf32> -> vector<256x128xf32>
    %12 = arith.addf %5, %11 : vector<256x128xf32>
    %c0_13 = arith.constant 0 : index
    %c0_14 = arith.constant 0 : index
    %c2 = arith.constant 2 : index
    %c0_15 = arith.constant 0 : index
    %13 = vector.load %arg1[%c0_13, %c0_14, %c2, %c0_15] : memref<1x18x18x4xf32, #tpu.memory_space<vmem>>, vector<1x16x16x4xf32>
    %14 = vector.shape_cast %13 : vector<1x16x16x4xf32> to vector<16x16x4xf32>
    %15 = vector.shape_cast %14 : vector<16x16x4xf32> to vector<256x4xf32>
    %c2_16 = arith.constant 2 : index
    %c0_17 = arith.constant 0 : index
    %c0_18 = arith.constant 0 : index
    %16 = vector.load %arg2[%c2_16, %c0_17, %c0_18] : memref<9x4x128xf32, #tpu.memory_space<vmem>>, vector<1x4x128xf32>
    %17 = vector.shape_cast %16 : vector<1x4x128xf32> to vector<4x128xf32>
    %cst_19 = arith.constant dense<0.000000e+00> : vector<256x128xf32>
    %18 = tpu.matmul %15, %17, %cst_19 {dimension_numbers = #tpu.dot_dimension_numbers<[1], [0], [0], [1], [0, 0, 1, 1], [], []>} : vector<256x4xf32>, vector<4x128xf32>, vector<256x128xf32> -> vector<256x128xf32>
    %19 = arith.addf %12, %18 : vector<256x128xf32>
    %c0_20 = arith.constant 0 : index
    %c1_21 = arith.constant 1 : index
    %c0_22 = arith.constant 0 : index
    %c0_23 = arith.constant 0 : index
    %20 = vector.load %arg1[%c0_20, %c1_21, %c0_22, %c0_23] : memref<1x18x18x4xf32, #tpu.memory_space<vmem>>, vector<1x16x16x4xf32>
    %21 = vector.shape_cast %20 : vector<1x16x16x4xf32> to vector<16x16x4xf32>
    %22 = vector.shape_cast %21 : vector<16x16x4xf32> to vector<256x4xf32>
    %c3 = arith.constant 3 : index
    %c0_24 = arith.constant 0 : index
    %c0_25 = arith.constant 0 : index
    %23 = vector.load %arg2[%c3, %c0_24, %c0_25] : memref<9x4x128xf32, #tpu.memory_space<vmem>>, vector<1x4x128xf32>
    %24 = vector.shape_cast %23 : vector<1x4x128xf32> to vector<4x128xf32>
    %cst_26 = arith.constant dense<0.000000e+00> : vector<256x128xf32>
    %25 = tpu.matmul %22, %24, %cst_26 {dimension_numbers = #tpu.dot_dimension_numbers<[1], [0], [0], [1], [0, 0, 1, 1], [], []>} : vector<256x4xf32>, vector<4x128xf32>, vector<256x128xf32> -> vector<256x128xf32>
    %26 = arith.addf %19, %25 : vector<256x128xf32>
    %c0_27 = arith.constant 0 : index
    %c1_28 = arith.constant 1 : index
    %c1_29 = arith.constant 1 : index
    %c0_30 = arith.constant 0 : index
    %27 = vector.load %arg1[%c0_27, %c1_28, %c1_29, %c0_30] : memref<1x18x18x4xf32, #tpu.memory_space<vmem>>, vector<1x16x16x4xf32>
    %28 = vector.shape_cast %27 : vector<1x16x16x4xf32> to vector<16x16x4xf32>
    %29 = vector.shape_cast %28 : vector<16x16x4xf32> to vector<256x4xf32>
    %c4 = arith.constant 4 : index
    %c0_31 = arith.constant 0 : index
    %c0_32 = arith.constant 0 : index
    %30 = vector.load %arg2[%c4, %c0_31, %c0_32] : memref<9x4x128xf32, #tpu.memory_space<vmem>>, vector<1x4x128xf32>
    %31 = vector.shape_cast %30 : vector<1x4x128xf32> to vector<4x128xf32>
    %cst_33 = arith.constant dense<0.000000e+00> : vector<256x128xf32>
    %32 = tpu.matmul %29, %31, %cst_33 {dimension_numbers = #tpu.dot_dimension_numbers<[1], [0], [0], [1], [0, 0, 1, 1], [], []>} : vector<256x4xf32>, vector<4x128xf32>, vector<256x128xf32> -> vector<256x128xf32>
    %33 = arith.addf %26, %32 : vector<256x128xf32>
    %c0_34 = arith.constant 0 : index
    %c1_35 = arith.constant 1 : index
    %c2_36 = arith.constant 2 : index
    %c0_37 = arith.constant 0 : index
    %34 = vector.load %arg1[%c0_34, %c1_35, %c2_36, %c0_37] : memref<1x18x18x4xf32, #tpu.memory_space<vmem>>, vector<1x16x16x4xf32>
    %35 = vector.shape_cast %34 : vector<1x16x16x4xf32> to vector<16x16x4xf32>
    %36 = vector.shape_cast %35 : vector<16x16x4xf32> to vector<256x4xf32>
    %c5 = arith.constant 5 : index
    %c0_38 = arith.constant 0 : index
    %c0_39 = arith.constant 0 : index
    %37 = vector.load %arg2[%c5, %c0_38, %c0_39] : memref<9x4x128xf32, #tpu.memory_space<vmem>>, vector<1x4x128xf32>
    %38 = vector.shape_cast %37 : vector<1x4x128xf32> to vector<4x128xf32>
    %cst_40 = arith.constant dense<0.000000e+00> : vector<256x128xf32>
    %39 = tpu.matmul %36, %38, %cst_40 {dimension_numbers = #tpu.dot_dimension_numbers<[1], [0], [0], [1], [0, 0, 1, 1], [], []>} : vector<256x4xf32>, vector<4x128xf32>, vector<256x128xf32> -> vector<256x128xf32>
    %40 = arith.addf %33, %39 : vector<256x128xf32>
    %c0_41 = arith.constant 0 : index
    %c2_42 = arith.constant 2 : index
    %c0_43 = arith.constant 0 : index
    %c0_44 = arith.constant 0 : index
    %41 = vector.load %arg1[%c0_41, %c2_42, %c0_43, %c0_44] : memref<1x18x18x4xf32, #tpu.memory_space<vmem>>, vector<1x16x16x4xf32>
    %42 = vector.shape_cast %41 : vector<1x16x16x4xf32> to vector<16x16x4xf32>
    %43 = vector.shape_cast %42 : vector<16x16x4xf32> to vector<256x4xf32>
    %c6 = arith.constant 6 : index
    %c0_45 = arith.constant 0 : index
    %c0_46 = arith.constant 0 : index
    %44 = vector.load %arg2[%c6, %c0_45, %c0_46] : memref<9x4x128xf32, #tpu.memory_space<vmem>>, vector<1x4x128xf32>
    %45 = vector.shape_cast %44 : vector<1x4x128xf32> to vector<4x128xf32>
    %cst_47 = arith.constant dense<0.000000e+00> : vector<256x128xf32>
    %46 = tpu.matmul %43, %45, %cst_47 {dimension_numbers = #tpu.dot_dimension_numbers<[1], [0], [0], [1], [0, 0, 1, 1], [], []>} : vector<256x4xf32>, vector<4x128xf32>, vector<256x128xf32> -> vector<256x128xf32>
    %47 = arith.addf %40, %46 : vector<256x128xf32>
    %c0_48 = arith.constant 0 : index
    %c2_49 = arith.constant 2 : index
    %c1_50 = arith.constant 1 : index
    %c0_51 = arith.constant 0 : index
    %48 = vector.load %arg1[%c0_48, %c2_49, %c1_50, %c0_51] : memref<1x18x18x4xf32, #tpu.memory_space<vmem>>, vector<1x16x16x4xf32>
    %49 = vector.shape_cast %48 : vector<1x16x16x4xf32> to vector<16x16x4xf32>
    %50 = vector.shape_cast %49 : vector<16x16x4xf32> to vector<256x4xf32>
    %c7 = arith.constant 7 : index
    %c0_52 = arith.constant 0 : index
    %c0_53 = arith.constant 0 : index
    %51 = vector.load %arg2[%c7, %c0_52, %c0_53] : memref<9x4x128xf32, #tpu.memory_space<vmem>>, vector<1x4x128xf32>
    %52 = vector.shape_cast %51 : vector<1x4x128xf32> to vector<4x128xf32>
    %cst_54 = arith.constant dense<0.000000e+00> : vector<256x128xf32>
    %53 = tpu.matmul %50, %52, %cst_54 {dimension_numbers = #tpu.dot_dimension_numbers<[1], [0], [0], [1], [0, 0, 1, 1], [], []>} : vector<256x4xf32>, vector<4x128xf32>, vector<256x128xf32> -> vector<256x128xf32>
    %54 = arith.addf %47, %53 : vector<256x128xf32>
    %c0_55 = arith.constant 0 : index
    %c2_56 = arith.constant 2 : index
    %c2_57 = arith.constant 2 : index
    %c0_58 = arith.constant 0 : index
    %55 = vector.load %arg1[%c0_55, %c2_56, %c2_57, %c0_58] : memref<1x18x18x4xf32, #tpu.memory_space<vmem>>, vector<1x16x16x4xf32>
    %56 = vector.shape_cast %55 : vector<1x16x16x4xf32> to vector<16x16x4xf32>
    %57 = vector.shape_cast %56 : vector<16x16x4xf32> to vector<256x4xf32>
    %c8 = arith.constant 8 : index
    %c0_59 = arith.constant 0 : index
    %c0_60 = arith.constant 0 : index
    %58 = vector.load %arg2[%c8, %c0_59, %c0_60] : memref<9x4x128xf32, #tpu.memory_space<vmem>>, vector<1x4x128xf32>
    %59 = vector.shape_cast %58 : vector<1x4x128xf32> to vector<4x128xf32>
    %cst_61 = arith.constant dense<0.000000e+00> : vector<256x128xf32>
    %60 = tpu.matmul %57, %59, %cst_61 {dimension_numbers = #tpu.dot_dimension_numbers<[1], [0], [0], [1], [0, 0, 1, 1], [], []>} : vector<256x4xf32>, vector<4x128xf32>, vector<256x128xf32> -> vector<256x128xf32>
    %61 = arith.addf %54, %60 : vector<256x128xf32>
    %c0_62 = arith.constant 0 : index
    %c0_63 = arith.constant 0 : index
    %c0_64 = arith.constant 0 : index
    %62 = vector.load %arg3[%c0_62, %c0_63, %c0_64] : memref<1x256x128xf32, #tpu.memory_space<vmem>>, vector<1x256x128xf32>
    %63 = vector.shape_cast %62 : vector<1x256x128xf32> to vector<256x128xf32>
    %64 = vector.shape_cast %61 : vector<256x128xf32> to vector<1x256x128xf32>
    tpu.vector_store %arg3[%c0_62, %c0_63, %c0_64], %64 {strides = array<i32>} : memref<1x256x128xf32, #tpu.memory_space<vmem>>, vector<1x256x128xf32>,
    return
  }
  func.func @transform_0(%arg0: i32) -> (i32, i32, i32, i32) {
    %c0_i32 = arith.constant 0 : i32
    %c0_i32_0 = arith.constant 0 : i32
    %c0_i32_1 = arith.constant 0 : i32
    %c0_i32_2 = arith.constant 0 : i32
    return %arg0, %c0_i32, %c0_i32_0, %c0_i32_1 : i32, i32, i32, i32
  }
  func.func @transform_1(%arg0: i32) -> (i32, i32, i32) {
    %c0_i32 = arith.constant 0 : i32
    %c0_i32_0 = arith.constant 0 : i32
    %c0_i32_1 = arith.constant 0 : i32
    %c0_i32_2 = arith.constant 0 : i32
    return %c0_i32, %c0_i32_0, %c0_i32_1 : i32, i32, i32
  }
  func.func @transform_2(%arg0: i32) -> (i32, i32, i32) {
    %c0_i32 = arith.constant 0 : i32
    %c0_i32_0 = arith.constant 0 : i32
    %c0_i32_1 = arith.constant 0 : i32
    return %arg0, %c0_i32, %c0_i32_0 : i32, i32, i32
  }
}

</mosaic_0001>

<bundles_post_ra>
// kernel: tpu_custom_call.1
= control target key start
LH: loop header
LB: loop body
LE: loop exit
PB: predicated region body
PF: predicated region fallthrough
CT: control target
= control target key end

     0   :  { %7 = vsyncpa [#allocation3], 0  ;;  %s6406_s0 = inlined_call_operand.vmem [shape: f32[2,18,18,4], index: 0, kind: input, shape index: {}]   ;;  %s6407_s1 = inlined_call_operand.vmem [shape: f32[9,4,128], index: 1, kind: input, shape index: {}]   ;;  %s6408_s2 = inlined_call_operand.hbm [shape: f32[2,256,128], index: 2, kind: output, shape index: {}]  }
   0x1   :  { %9 = vsyncpa [#allocation3 + $0x1], 0  ;;  %s5337_s9 = smov 0   ;;  %s5339_s10 = smov 0  }
   0x2   :  { %s5341_s11 = smov 0   ;;  %s5343_s12 = smov 0  }
   0x3 LB: > { %s5358_s13 = sadd.s32 4294967295, %s5317_s12   ;;  %s3699_s14 = sadd.s32 4294967294, %s5317_s12   ;;  %s5317_s12 = sphi %s5343_s12, %s6523_s12   ;;  %s5313_s11 = sphi %s5341_s11, %s6522_s11   ;;  %s5309_s10 = sphi %s5339_s10, %s6521_s10   ;;  %s5305_s9 = sphi %s5337_s9, %s6520_s9  }
   0x4   : > { %s5362_s15 = sadd.s32 1, %s5317_s12   ;;  %s69_s16 = sadd.s32 1, %s5313_s11 }
   0x5   : > { %s66_s17 = ssub.s32 %s5317_s12, %s5362_s15  ;;  %p79_p0 = scmp.ne.s32.totalorder %s5313_s11, %s5309_s10 }
   0x6   : > { %p67_p1 = scmp.eq.s32.totalorder %s66_s17, 0  ;;  %p80_p2 = scmp.eq.s32.totalorder %s5358_s13, 1 }
   0x7   : > { %p85_p3 = scmp.ne.s32.totalorder %s5309_s10, %s5305_s9  ;;  %p86_p4 = scmp.eq.s32.totalorder %s3699_s14, 1 }
   0x8   : > { %s5373_s18 = scalar_select %p67_p1, %s5313_s11, %s69_s16  }
   0x9   : > { %p5375_p5 = por %p80_p2, %p79_p0  ;;  %p5379_p6 = por %p86_p4, %p85_p3 }
   0xa   : > { %p3702_p7 = scmp.ge.s32.totalorder %s5317_s12, 1  ;;  %p115_p8 = scmp.lt.s32.totalorder %s5317_s12, 3 }
   0xc   : > { %p116_p9 = pnand %p3702_p7, %p115_p8 }
   0xe   : > { %119 = sbr.rel (%p116_p9) target bundleno = 544 (0x220), region = 28 }
  0x15   : > { %v3705_v0 = vld [vmem:[%s6407_s1 + $0x4] sm:$0xf]  ;;  %vm306_vm0 = vcmask 1043456   ;;  %v5391_v1 = vld [vmem:[%s6407_s1 + $0x10] sm:$0xf]  ;;  %p137_p10 = scmp.lt.s32.totalorder %s5358_s13, 1 }
  0x16   : > { %4505 = vmatprep.subr.msk.mxu1 %vm306_vm0, %v3705_v0  ;;  %4705 = vmatprep.subr.msk.mxu0 %vm306_vm0, %v5391_v1  ;;  %v174_v2 = vld [vmem:[%s6407_s1] sm:$0xf]  ;;  %v3970_v3 = vld [vmem:[%s6407_s1 + $0x14] sm:$0xf]  ;;  %vm209_vm1 = vcmask 31744   ;;  %s134_s25 = sand.u32 1, %s5309_s10  }
  0x17   : > { %4506 = vmatpush3.msk.msra.mxu1 %vm306_vm0, %v3705_v0  ;;  %4706 = vmatpush3.msk.msra.mxu0 %vm306_vm0, %v5391_v1  ;;  %s138_s29 = scalar_select %p137_p10, %s5358_s13, 1  ;;  %v4036_v9 = vld [vmem:[%s6407_s1 + $0x18] sm:$0xf]  ;;  %v5431_v10 = vld [vmem:[%s6407_s1 + $0x8] sm:$0xf] }
  0x18   : > { %4555 = vmatprep.subr.msk.mxu1 %vm306_vm0, %v174_v2  ;;  %4755 = vmatprep.subr.msk.mxu0 %vm306_vm0, %v3970_v3  ;;  %v5550_v28 = vld [vmem:[%s6407_s1 + $0x1c] sm:$0xf]  ;;  %v5713_v61 = vld [vmem:[%s6407_s1 + $0xc] sm:$0xf]  ;;  %s3703_s26 = sshll.u32 %s134_s25, 8  ;;  %s4207_s28 = sshll.u32 %s5358_s13, 12 }
  0x19   : > { %s5213_s30 = smul.u32 432, %s138_s29  ;;  %s6320_s27 = scalar_lea.vmem [#allocation2], %s3703_s26 }
  0x1a   : > { %s3637_s29 = sshll.u32 %s6320_s27, 4  ;;  %s6357_s4 = scalar_lea.hbm %s6408_s2, %s4207_s28  ;;  %s6359_s29 = int_to_ptr.vmem [resolvable:$true] %s3637_s29 }
  0x1b   : > { %s5412_s5 = scalar_lea.vmem %s6406_s0, %s5213_s30  ;;  %s6365_s13 = scalar_lea.sflag [#allocation3], %s134_s25 }
  0x1c   : > { %v175_v4 = vld [vmem:[%s5412_s5 + $0x1] sm:$0xff]  ;;  %v3872_v5 = vld [vmem:[%s5412_s5 + $0x19] sm:$0xff]  ;;  %v176_v6 = vld [vmem:[%s5412_s5 + $0x9] sm:$0xff]  ;;  %s5319_s6 = smov [#allocation2]  }
  0x1d   : > { %4507 = vmatprep.mubr.msk.f32.mxu1 %vm209_vm1, %v175_v4  ;;  %4707 = vmatprep.mubr.msk.f32.mxu0 %vm209_vm1, %v3872_v5  ;;  %v3873_v7 = vld [vmem:[%s5412_s5 + $0x21] sm:$0xff]  ;;  %v5421_v8 = vld [vmem:[%s5412_s5 + $0x31] sm:$0xff]  ;;  %v5436_v11 = vld [vmem:[%s5412_s5 + $0x39] sm:$0xff]  ;;  %s5259_s7 = sshll.u32 %s5319_s6, 4  ;;  %s5260_s7 = int_to_ptr.vmem [resolvable:$false] %s5259_s7 }
  0x1e   : > { %4508 = vmatmul.mubr.msk.f32.vlgmr.msra.gmra.mrb[0].mxu1 %vm209_vm1, %v176_v6  ;;  %4708 = vmatmul.mubr.msk.f32.vlgmr.msra.gmra.mrb[0].mxu0 %vm209_vm1, %v3873_v7  ;;  %v5442_v12 = vld [vmem:[%s5412_s5 + $0x49] sm:$0xff]  ;;  %v5455_v13 = vld [vmem:[%s5412_s5 + $0x51] sm:$0xff]  ;;  %v5458_v14 = vld [vmem:[%s5412_s5 + $0x61] sm:$0xff]  ;;  %s5261_s8 = scalar_lea.vmem %s5260_s7, 8192  ;;  %p5262_p0 = scmp.lt.s32.totalorder %s6359_s29, %s5260_s7 }
  0x1f   : > { %4556 = vmatpush3.msk.msra.mxu1 %vm306_vm0, %v174_v2  ;;  %4756 = vmatpush3.msk.msra.mxu0 %vm306_vm0, %v3970_v3  ;;  %v5469_v15 = vld [vmem:[%s5412_s5 + $0x69] sm:$0xff]  ;;  %v5472_v16 = vld [vmem:[%s5412_s5 + $0x79] sm:$0xff]  ;;  %v5483_v17 = vld [vmem:[%s5412_s5 + $0x81] sm:$0xff] }
  0x20   : > { %4510 = vmatprep.mubr.msk.f32.mxu1 %vm209_vm1, %v3872_v5  ;;  %4710 = vmatprep.mubr.msk.f32.mxu0 %vm209_vm1, %v5421_v8  ;;  %v5486_v18 = vld [vmem:[%s5412_s5 + $0x91] sm:$0xff]  ;;  %v5497_v19 = vld [vmem:[%s5412_s5 + $0x99] sm:$0xff]  ;;  %v5500_v20 = vld [vmem:[%s5412_s5 + $0xa9] sm:$0xff] }
  0x21   : > { %4805 = vmatprep.subr.msk.mxu0 %vm306_vm0, %v4036_v9  ;;  %4605 = vmatprep.subr.msk.mxu1 %vm306_vm0, %v5431_v10  ;;  %v5511_v21 = vld [vmem:[%s5412_s5 + $0xb1] sm:$0xff]  ;;  %v5514_v22 = vld [vmem:[%s5412_s5 + $0xc1] sm:$0xff]  ;;  %v5525_v23 = vld [vmem:[%s5412_s5 + $0xc9] sm:$0xff] }
  0x22   : > { %4511 = vmatmul.mubr.msk.f32.gmra.mrb[2].mxu1 %vm209_vm1, %v3873_v7  ;;  %4711 = vmatmul.mubr.msk.f32.gmra.mrb[2].mxu0 %vm209_vm1, %v5436_v11  ;;  %v5528_v24 = vld [vmem:[%s5412_s5 + $0x1a] sm:$0xff]  ;;  %v5539_v25 = vld [vmem:[%s5412_s5 + $0x22] sm:$0xff]  ;;  %v5545_v27 = vld [vmem:[%s5412_s5 + $0x32] sm:$0xff] }
  0x23   : > { %4513 = vmatprep.mubr.msk.f32.mxu1 %vm209_vm1, %v5421_v8  ;;  %4713 = vmatprep.mubr.msk.f32.mxu0 %vm209_vm1, %v5442_v12  ;;  %v5542_v26 = vld [vmem:[%s5412_s5 + $0xd9] sm:$0xff]  ;;  %v5560_v29 = vld [vmem:[%s5412_s5 + $0xe1] sm:$0xff]  ;;  %v5568_v31 = vld [vmem:[%s5412_s5 + $0xf1] sm:$0xff] }
  0x24   : > { %6456 = vst [vmem:[#allocation5_spill] sm:$0xff] %v5560_v29  ;;  %v5563_v30 = vld [vmem:[%s5412_s5 + $0x3a] sm:$0xff]  ;;  %6457 = vst [vmem:[#allocation6_spill] sm:$0xff] %v5568_v31  ;;  %v5571_v32 = vld [vmem:[%s5412_s5 + $0x4a] sm:$0xff] }
  0x25   : > { %v5584_v33 = vld [vmem:[%s5412_s5 + $0xf9] sm:$0xff]  ;;  %v5590_v35 = vld [vmem:[%s5412_s5 + $0x109] sm:$0xff]  ;;  %v5604_v37 = vld [vmem:[%s5412_s5 + $0x111] sm:$0xff] }
  0x26   : > { %4514 = vmatmul.mubr.msk.f32.gmra.mrb[4].mxu1 %vm209_vm1, %v5436_v11  ;;  %4714 = vmatmul.mubr.msk.f32.gmra.mrb[4].mxu0 %vm209_vm1, %v5455_v13  ;;  %6458 = vst [vmem:[#allocation7_spill] sm:$0xff] %v5584_v33  ;;  %v5587_v34 = vld [vmem:[%s5412_s5 + $0x52] sm:$0xff]  ;;  %6459 = vst [vmem:[#allocation8_spill] sm:$0xff] %v5590_v35  ;;  %v5593_v36 = vld [vmem:[%s5412_s5 + $0x62] sm:$0xff] }
  0x27   : > { %4516 = vmatprep.mubr.msk.f32.mxu1 %vm209_vm1, %v5442_v12  ;;  %4716 = vmatprep.mubr.msk.f32.mxu0 %vm209_vm1, %v5458_v14  ;;  %6460 = vst [vmem:[#allocation9_spill] sm:$0xff] %v5604_v37  ;;  %v5607_v38 = vld [vmem:[%s5412_s5 + $0x6a] sm:$0xff]  ;;  %v5610_v39 = vld [vmem:[%s5412_s5 + $0x121] sm:$0xff]  ;;  %v5630_v43 = vld [vmem:[%s5412_s5 + $0x139] sm:$0xff] }
  0x28   : > { %6461 = vst [vmem:[#allocation10_spill] sm:$0xff] %v5610_v39  ;;  %v5613_v40 = vld [vmem:[%s5412_s5 + $0x7a] sm:$0xff]  ;;  %v5624_v41 = vld [vmem:[%s5412_s5 + $0x129] sm:$0xff]  ;;  %6463 = vst [vmem:[#allocation12_spill] sm:$0xff] %v5630_v43 }
  0x29   : > { %6462 = vst [vmem:[#allocation11_spill] sm:$0xff] %v5624_v41  ;;  %v5627_v42 = vld [vmem:[%s5412_s5 + $0x82] sm:$0xff]  ;;  %v5633_v44 = vld [vmem:[%s5412_s5 + $0x92] sm:$0xff]  ;;  %v5647_v46 = vld [vmem:[%s5412_s5 + $0x9a] sm:$0xff] }
  0x2a   : > { %4517 = vmatmul.mubr.msk.f32.gmra.mrb[6].mxu1 %vm209_vm1, %v5455_v13  ;;  %4717 = vmatmul.mubr.msk.f32.gmra.mrb[6].mxu0 %vm209_vm1, %v5469_v15  ;;  %v5644_v45 = vld [vmem:[%s5412_s5 + $0x141] sm:$0xff]  ;;  %v5650_v47 = vld [vmem:[%s5412_s5 + $0x151] sm:$0xff]  ;;  %v5664_v49 = vld [vmem:[%s5412_s5 + $0x159] sm:$0xff] }
  0x2b   : > { %4519 = vmatprep.mubr.msk.f32.mxu1 %vm209_vm1, %v5458_v14  ;;  %4719 = vmatprep.mubr.msk.f32.mxu0 %vm209_vm1, %v5472_v16  ;;  %6464 = vst [vmem:[#allocation13_spill] sm:$0xff] %v5644_v45  ;;  %6465 = vst [vmem:[#allocation14_spill] sm:$0xff] %v5650_v47  ;;  %v5653_v48 = vld [vmem:[%s5412_s5 + $0xaa] sm:$0xff]  ;;  %v5667_v50 = vld [vmem:[%s5412_s5 + $0xb2] sm:$0xff] }
  0x2c   : > { %6466 = vst [vmem:[#allocation15_spill] sm:$0xff] %v5664_v49  ;;  %v5670_v51 = vld [vmem:[%s5412_s5 + $0x169] sm:$0xff]  ;;  %v5684_v53 = vld [vmem:[%s5412_s5 + $0x171] sm:$0xff]  ;;  %v142_v55 = vld [vmem:[%s5412_s5] sm:$0xff] }
  0x2d   : > { %6467 = vst [vmem:[#allocation16_spill] sm:$0xff] %v5670_v51  ;;  %v5673_v52 = vld [vmem:[%s5412_s5 + $0xc2] sm:$0xff]  ;;  %6468 = vst [vmem:[#allocation17_spill] sm:$0xff] %v5684_v53  ;;  %v5687_v54 = vld [vmem:[%s5412_s5 + $0xca] sm:$0xff] }
  0x2e   : > { %4520 = vmatmul.mubr.msk.f32.gmra.mrb[8].mxu1 %vm209_vm1, %v5469_v15  ;;  %4720 = vmatmul.mubr.msk.f32.gmra.mrb[8].mxu0 %vm209_vm1, %v5483_v17  ;;  %v5691_v56 = vld [vmem:[%s5412_s5 + $0xda] sm:$0xff]  ;;  %v143_v57 = vld [vmem:[%s5412_s5 + $0x8] sm:$0xff]  ;;  %v5708_v60 = vld [vmem:[%s5412_s5 + $0xf2] sm:$0xff] }
  0x2f   : > { %4522 = vmatprep.mubr.msk.f32.mxu1 %vm209_vm1, %v5472_v16  ;;  %4722 = vmatprep.mubr.msk.f32.mxu0 %vm209_vm1, %v5486_v18  ;;  %v5702_v58 = vld [vmem:[%s5412_s5 + $0xe2] sm:$0xff]  ;;  %v5705_v59 = vld [vmem:[%s5412_s5 + $0x18] sm:$0xff]  ;;  %v5731_v0 = vld [vmem:[%s5412_s5 + $0x30] sm:$0xff] }
  0x30   : > { %6469 = vst [vmem:[#allocation18_spill] sm:$0xff] %v5705_v59  ;;  %v5723_v62 = vld [vmem:[%s5412_s5 + $0x20] sm:$0xff]  ;;  %6471 = vst [vmem:[#allocation20_spill] sm:$0xff] %v5731_v0  ;;  %v5734_v2 = vld [vmem:[%s5412_s5 + $0x10a] sm:$0xff] }
  0x31   : > { %6470 = vst [vmem:[#allocation19_spill] sm:$0xff] %v5723_v62  ;;  %v5726_v63 = vld [vmem:[%s5412_s5 + $0xfa] sm:$0xff]  ;;  %v5750_v4 = vld [vmem:[%s5412_s5 + $0x112] sm:$0xff]  ;;  %v5753_v5 = vld [vmem:[%s5412_s5 + $0x48] sm:$0xff] }
  0x32   : > { %4523 = vmatmul.mubr.msk.f32.gmra.mrb[10].mxu1 %vm209_vm1, %v5483_v17  ;;  %4723 = vmatmul.mubr.msk.f32.gmra.mrb[10].mxu0 %vm209_vm1, %v5497_v19  ;;  %v5747_v3 = vld [vmem:[%s5412_s5 + $0x38] sm:$0xff]  ;;  %6473 = vst [vmem:[#allocation22_spill] sm:$0xff] %v5753_v5  ;;  %v5756_v6 = vld [vmem:[%s5412_s5 + $0x122] sm:$0xff]  ;;  %v5767_v7 = vld [vmem:[%s5412_s5 + $0x50] sm:$0xff] }
  0x33   : > { %4525 = vmatprep.mubr.msk.f32.mxu1 %vm209_vm1, %v5486_v18  ;;  %4725 = vmatprep.mubr.msk.f32.mxu0 %vm209_vm1, %v5500_v20  ;;  %6472 = vst [vmem:[#allocation21_spill] sm:$0xff] %v5747_v3  ;;  %6474 = vst [vmem:[#allocation23_spill] sm:$0xff] %v5767_v7 }
  0x36   : > { %4526 = vmatmul.mubr.msk.f32.gmra.mrb[12].mxu1 %vm209_vm1, %v5497_v19  ;;  %4726 = vmatmul.mubr.msk.f32.gmra.mrb[12].mxu0 %vm209_vm1, %v5511_v21 }
  0x37   : > { %4528 = vmatprep.mubr.msk.f32.mxu1 %vm209_vm1, %v5500_v20  ;;  %4728 = vmatprep.mubr.msk.f32.mxu0 %vm209_vm1, %v5514_v22 }
  0x3a   : > { %4529 = vmatmul.mubr.msk.f32.gmra.mrb[14].mxu1 %vm209_vm1, %v5511_v21  ;;  %4729 = vmatmul.mubr.msk.f32.gmra.mrb[14].mxu0 %vm209_vm1, %v5525_v23 }
  0x3b   : > { %4531 = vmatprep.mubr.msk.f32.mxu1 %vm209_vm1, %v5514_v22  ;;  %4757 = vmatprep.mubr.msk.f32.mxu0 %vm209_vm1, %v5528_v24 }
  0x3e   : > { %4532 = vmatmul.mubr.msk.f32.gmra.mrb[16].mxu1 %vm209_vm1, %v5525_v23  ;;  %4758 = vmatmul.mubr.msk.f32.vlgmr.msra.gmra.mrb[0].mxu0 %vm209_vm1, %v5539_v25 }
  0x3f   : > { %4806 = vmatpush3.msk.msra.mxu0 %vm306_vm0, %v4036_v9  ;;  %4534 = vmatprep.mubr.msk.f32.mxu1 %vm209_vm1, %v5542_v26  ;;  %v5770_v9 = vld [vmem:[%s5412_s5 + $0x12a] sm:$0xff] }
  0x40   : > { %4760 = vmatprep.mubr.msk.f32.mxu0 %vm209_vm1, %v5545_v27  ;;  %4855 = vmatprep.subr.msk.mxu0 %vm306_vm0, %v5550_v28 }
  0x42   : > { %4535 = vmatmul.mubr.msk.f32.gmra.mrb[18].mxu1 %vm209_vm1, %v5560_v29  ;;  %4761 = vmatmul.mubr.msk.f32.gmra.mrb[2].mxu0 %vm209_vm1, %v5563_v30  ;;  %v5867_v29 = vld [vmem:[%s5412_s5 + $0xd8] sm:$0xff] }
  0x43   : > { %4537 = vmatprep.mubr.msk.f32.mxu1 %vm209_vm1, %v5568_v31  ;;  %4763 = vmatprep.mubr.msk.f32.mxu0 %vm209_vm1, %v5571_v32  ;;  %v5850_v31 = vld [vmem:[%s5412_s5 + $0x18a] sm:$0xff] }
  0x44   : > { %6485 = vst [vmem:[#allocation34_spill] sm:$0xff] %v5850_v31 }
  0x46   : > { %4538 = vmatmul.mubr.msk.f32.gmra.mrb[20].mxu1 %vm209_vm1, %v5584_v33  ;;  %4764 = vmatmul.mubr.msk.f32.gmra.mrb[4].mxu0 %vm209_vm1, %v5587_v34  ;;  %v5836_v33 = vld [vmem:[%s5412_s5 + $0x182] sm:$0xff] }
  0x47   : > { %4540 = vmatprep.mubr.msk.f32.mxu1 %vm209_vm1, %v5590_v35  ;;  %4766 = vmatprep.mubr.msk.f32.mxu0 %vm209_vm1, %v5593_v36  ;;  %v5833_v35 = vld [vmem:[%s5412_s5 + $0xa8] sm:$0xff]  ;;  %6483 = vst [vmem:[#allocation32_spill] sm:$0xff] %v5836_v33 }
  0x48   : > { %6482 = vst [vmem:[#allocation31_spill] sm:$0xff] %v5833_v35 }
  0x4a   : > { %4541 = vmatmul.mubr.msk.f32.gmra.mrb[22].mxu1 %vm209_vm1, %v5604_v37  ;;  %4767 = vmatmul.mubr.msk.f32.gmra.mrb[6].mxu0 %vm209_vm1, %v5607_v38  ;;  %v5830_v37 = vld [vmem:[%s5412_s5 + $0x172] sm:$0xff] }
  0x4b   : > { %4543 = vmatprep.mubr.msk.f32.mxu1 %vm209_vm1, %v5610_v39  ;;  %4769 = vmatprep.mubr.msk.f32.mxu0 %vm209_vm1, %v5613_v40  ;;  %v5827_v39 = vld [vmem:[%s5412_s5 + $0x98] sm:$0xff]  ;;  %6481 = vst [vmem:[#allocation30_spill] sm:$0xff] %v5830_v37 }
  0x4c   : > { %6480 = vst [vmem:[#allocation29_spill] sm:$0xff] %v5827_v39 }
  0x4e   : > { %4544 = vmatmul.mubr.msk.f32.gmra.mrb[24].mxu1 %vm209_vm1, %v5624_v41  ;;  %4770 = vmatmul.mubr.msk.f32.gmra.mrb[8].mxu0 %vm209_vm1, %v5627_v42  ;;  %v5816_v41 = vld [vmem:[%s5412_s5 + $0x16a] sm:$0xff] }
  0x4f   : > { %4546 = vmatprep.mubr.msk.f32.mxu1 %vm209_vm1, %v5630_v43  ;;  %4772 = vmatprep.mubr.msk.f32.mxu0 %vm209_vm1, %v5633_v44  ;;  %v5813_v43 = vld [vmem:[%s5412_s5 + $0x90] sm:$0xff] }
  0x50   : > { %6479 = vst [vmem:[#allocation28_spill] sm:$0xff] %v5813_v43 }
  0x52   : > { %4547 = vmatmul.mubr.msk.f32.gmra.mrb[26].mxu1 %vm209_vm1, %v5644_v45  ;;  %4773 = vmatmul.mubr.msk.f32.gmra.mrb[10].mxu0 %vm209_vm1, %v5647_v46  ;;  %v5810_v45 = vld [vmem:[%s5412_s5 + $0x15a] sm:$0xff] }
  0x53   : > { %4549 = vmatprep.mubr.msk.f32.mxu1 %vm209_vm1, %v5650_v47  ;;  %4775 = vmatprep.mubr.msk.f32.mxu0 %vm209_vm1, %v5653_v48  ;;  %v5807_v47 = vld [vmem:[%s5412_s5 + $0x80] sm:$0xff] }
  0x54   : > { %6478 = vst [vmem:[#allocation27_spill] sm:$0xff] %v5807_v47 }
  0x56   : > { %4550 = vmatmul.mubr.msk.f32.gmra.mrb[28].mxu1 %vm209_vm1, %v5664_v49  ;;  %4776 = vmatmul.mubr.msk.f32.gmra.mrb[12].mxu0 %vm209_vm1, %v5667_v50  ;;  %v5796_v49 = vld [vmem:[%s5412_s5 + $0x152] sm:$0xff] }
  0x57   : > { %4552 = vmatprep.mubr.msk.f32.mxu1 %vm209_vm1, %v5670_v51  ;;  %4778 = vmatprep.mubr.msk.f32.mxu0 %vm209_vm1, %v5673_v52  ;;  %v5793_v51 = vld [vmem:[%s5412_s5 + $0x78] sm:$0xff] }
  0x58   : > { %6477 = vst [vmem:[#allocation26_spill] sm:$0xff] %v5793_v51 }
  0x5a   : > { %4553 = vmatmul.mubr.msk.f32.gmra.mrb[30].mxu1 %vm209_vm1, %v5684_v53  ;;  %4779 = vmatmul.mubr.msk.f32.gmra.mrb[14].mxu0 %vm209_vm1, %v5687_v54  ;;  %v5790_v53 = vld [vmem:[%s5412_s5 + $0x142] sm:$0xff] }
  0x5b   : > { %4557 = vmatprep.mubr.msk.f32.mxu1 %vm209_vm1, %v142_v55  ;;  %4781 = vmatprep.mubr.msk.f32.mxu0 %vm209_vm1, %v5691_v56  ;;  %v5776_v55 = vld [vmem:[%s5412_s5 + $0x13a] sm:$0xff] }
  0x5e   : > { %4558 = vmatmul.mubr.msk.f32.vlgmr.msra.gmra.mrb[0].mxu1 %vm209_vm1, %v143_v57  ;;  %4782 = vmatmul.mubr.msk.f32.gmra.mrb[16].mxu0 %vm209_vm1, %v5702_v58  ;;  %v5787_v57 = vld [vmem:[%s5412_s5 + $0x68] sm:$0xff] }
  0x5f   : > { %4606 = vmatpush3.msk.msra.mxu1 %vm306_vm0, %v5431_v10  ;;  %4560 = vmatprep.mubr.msk.f32.mxu1 %vm209_vm1, %v5705_v59  ;;  %v5773_v10 = vld [vmem:[%s5412_s5 + $0x60] sm:$0xff]  ;;  %6476 = vst [vmem:[#allocation25_spill] sm:$0xff] %v5787_v57 }
  0x60   : > { %4784 = vmatprep.mubr.msk.f32.mxu0 %vm209_vm1, %v5708_v60  ;;  %4655 = vmatprep.subr.msk.mxu1 %vm306_vm0, %v5713_v61  ;;  %6475 = vst [vmem:[#allocation24_spill] sm:$0xff] %v5773_v10  ;;  %v5853_v59 = vld [vmem:[%s5412_s5 + $0xc0] sm:$0xff] }
  0x62   : > { %4561 = vmatmul.mubr.msk.f32.gmra.mrb[2].mxu1 %vm209_vm1, %v5723_v62  ;;  %4785 = vmatmul.mubr.msk.f32.gmra.mrb[18].mxu0 %vm209_vm1, %v5726_v63  ;;  %v5847_v62 = vld [vmem:[%s5412_s5 + $0xb0] sm:$0xff] }
  0x63   : > { %4563 = vmatprep.mubr.msk.f32.mxu1 %vm209_vm1, %v5731_v0  ;;  %4787 = vmatprep.mubr.msk.f32.mxu0 %vm209_vm1, %v5734_v2  ;;  %6484 = vst [vmem:[#allocation33_spill] sm:$0xff] %v5847_v62 }
  0x66   : > { %4564 = vmatmul.mubr.msk.f32.gmra.mrb[4].mxu1 %vm209_vm1, %v5747_v3  ;;  %4788 = vmatmul.mubr.msk.f32.gmra.mrb[20].mxu0 %vm209_vm1, %v5750_v4 }
  0x67   : > { %4566 = vmatprep.mubr.msk.f32.mxu1 %vm209_vm1, %v5753_v5  ;;  %4790 = vmatprep.mubr.msk.f32.mxu0 %vm209_vm1, %v5756_v6 }
  0x6a   : > { %4567 = vmatmul.mubr.msk.f32.gmra.mrb[6].mxu1 %vm209_vm1, %v5767_v7  ;;  %4791 = vmatmul.mubr.msk.f32.gmra.mrb[22].mxu0 %vm209_vm1, %v5770_v9 }
  0x6b   : > { %4569 = vmatprep.mubr.msk.f32.mxu1 %vm209_vm1, %v5773_v10  ;;  %4793 = vmatprep.mubr.msk.f32.mxu0 %vm209_vm1, %v5776_v55 }
  0x6e   : > { %4570 = vmatmul.mubr.msk.f32.gmra.mrb[8].mxu1 %vm209_vm1, %v5787_v57  ;;  %4794 = vmatmul.mubr.msk.f32.gmra.mrb[24].mxu0 %vm209_vm1, %v5790_v53 }
  0x6f   : > { %4572 = vmatprep.mubr.msk.f32.mxu1 %vm209_vm1, %v5793_v51  ;;  %4796 = vmatprep.mubr.msk.f32.mxu0 %vm209_vm1, %v5796_v49 }
  0x72   : > { %4573 = vmatmul.mubr.msk.f32.gmra.mrb[10].mxu1 %vm209_vm1, %v5807_v47  ;;  %4797 = vmatmul.mubr.msk.f32.gmra.mrb[26].mxu0 %vm209_vm1, %v5810_v45 }
  0x73   : > { %4575 = vmatprep.mubr.msk.f32.mxu1 %vm209_vm1, %v5813_v43  ;;  %4799 = vmatprep.mubr.msk.f32.mxu0 %vm209_vm1, %v5816_v41 }
  0x76   : > { %4576 = vmatmul.mubr.msk.f32.gmra.mrb[12].mxu1 %vm209_vm1, %v5827_v39  ;;  %4800 = vmatmul.mubr.msk.f32.gmra.mrb[28].mxu0 %vm209_vm1, %v5830_v37  ;;  %v5872_v37 = vld [vmem:[%s6407_s1 + $0x20] sm:$0xf] }
  0x77   : > { %4578 = vmatprep.mubr.msk.f32.mxu1 %vm209_vm1, %v5833_v35  ;;  %4802 = vmatprep.mubr.msk.f32.mxu0 %vm209_vm1, %v5836_v33  ;;  %v5864_v33 = vld [vmem:[%s5412_s5 + $0xc8] sm:$0xff] }
  0x78   : > { %6486 = vst [vmem:[#allocation35_spill] sm:$0xff] %v5864_v33 }
  0x7a   : > { %4579 = vmatmul.mubr.msk.f32.gmra.mrb[14].mxu1 %vm209_vm1, %v5847_v62  ;;  %4803 = vmatmul.mubr.msk.f32.gmra.mrb[30].mxu0 %vm209_vm1, %v5850_v31  ;;  %v5883_v31 = vld [vmem:[%s5412_s5 + $0xe0] sm:$0xff] }
  0x7b   : > { %4581 = vmatprep.mubr.msk.f32.mxu1 %vm209_vm1, %v5853_v59  ;;  %4807 = vmatprep.mubr.msk.f32.mxu0 %vm209_vm1, %v5731_v0  ;;  %v5888_v0 = vld [vmem:[%s5412_s5 + $0xf0] sm:$0xff] }
  0x7e   : > { %4582 = vmatmul.mubr.msk.f32.gmra.mrb[16].mxu1 %vm209_vm1, %v5864_v33  ;;  %4808 = vmatmul.mubr.msk.f32.vlgmr.msra.gmra.mrb[0].mxu0 %vm209_vm1, %v5747_v3  ;;  %v859_v3 = vld [vmem:[%s5412_s5 + $0x2] sm:$0xff] }
  0x7f   : > { %4856 = vmatpush3.msk.msra.mxu0 %vm306_vm0, %v5550_v28  ;;  %4584 = vmatprep.mubr.msk.f32.mxu1 %vm209_vm1, %v5867_v29  ;;  %v5901_v28 = vld [vmem:[%s5412_s5 + $0xf8] sm:$0xff] }
  0x80   : > { %4810 = vmatprep.mubr.msk.f32.mxu0 %vm209_vm1, %v5753_v5  ;;  %4905 = vmatprep.subr.msk.mxu0 %vm306_vm0, %v5872_v37  ;;  %v5904_v5 = vld [vmem:[%s5412_s5 + $0x108] sm:$0xff] }
  0x82   : > { %4585 = vmatmul.mubr.msk.f32.gmra.mrb[18].mxu1 %vm209_vm1, %v5883_v31  ;;  %4811 = vmatmul.mubr.msk.f32.gmra.mrb[2].mxu0 %vm209_vm1, %v5767_v7  ;;  %v5915_v7 = vld [vmem:[%s5412_s5 + $0x110] sm:$0xff] }
  0x83   : > { %4587 = vmatprep.mubr.msk.f32.mxu1 %vm209_vm1, %v5888_v0  ;;  %4813 = vmatprep.mubr.msk.f32.mxu0 %vm209_vm1, %v5773_v10  ;;  %v5918_v10 = vld [vmem:[%s5412_s5 + $0x120] sm:$0xff] }
  0x86   : > { %4588 = vmatmul.mubr.msk.f32.gmra.mrb[20].mxu1 %vm209_vm1, %v5901_v28  ;;  %4814 = vmatmul.mubr.msk.f32.gmra.mrb[4].mxu0 %vm209_vm1, %v5787_v57  ;;  %v5929_v57 = vld [vmem:[%s5412_s5 + $0x128] sm:$0xff] }
  0x87   : > { %4590 = vmatprep.mubr.msk.f32.mxu1 %vm209_vm1, %v5904_v5  ;;  %4816 = vmatprep.mubr.msk.f32.mxu0 %vm209_vm1, %v5793_v51  ;;  %v5932_v51 = vld [vmem:[%s5412_s5 + $0x138] sm:$0xff] }
  0x8a   : > { %4591 = vmatmul.mubr.msk.f32.gmra.mrb[22].mxu1 %vm209_vm1, %v5915_v7  ;;  %4817 = vmatmul.mubr.msk.f32.gmra.mrb[6].mxu0 %vm209_vm1, %v5807_v47  ;;  %v5943_v47 = vld [vmem:[%s5412_s5 + $0x140] sm:$0xff] }
  0x8b   : > { %4593 = vmatprep.mubr.msk.f32.mxu1 %vm209_vm1, %v5918_v10  ;;  %4819 = vmatprep.mubr.msk.f32.mxu0 %vm209_vm1, %v5813_v43  ;;  %v5946_v43 = vld [vmem:[%s5412_s5 + $0x150] sm:$0xff] }
  0x8e   : > { %4594 = vmatmul.mubr.msk.f32.gmra.mrb[24].mxu1 %vm209_vm1, %v5929_v57  ;;  %4820 = vmatmul.mubr.msk.f32.gmra.mrb[8].mxu0 %vm209_vm1, %v5827_v39  ;;  %v5957_v39 = vld [vmem:[%s5412_s5 + $0x158] sm:$0xff] }
  0x8f   : > { %4596 = vmatprep.mubr.msk.f32.mxu1 %vm209_vm1, %v5932_v51  ;;  %4822 = vmatprep.mubr.msk.f32.mxu0 %vm209_vm1, %v5833_v35  ;;  %v5960_v35 = vld [vmem:[%s5412_s5 + $0x168] sm:$0xff] }
  0x92   : > { %4597 = vmatmul.mubr.msk.f32.gmra.mrb[26].mxu1 %vm209_vm1, %v5943_v47  ;;  %4823 = vmatmul.mubr.msk.f32.gmra.mrb[10].mxu0 %vm209_vm1, %v5847_v62  ;;  %v5971_v62 = vld [vmem:[%s5412_s5 + $0x170] sm:$0xff] }
  0x93   : > { %4599 = vmatprep.mubr.msk.f32.mxu1 %vm209_vm1, %v5946_v43  ;;  %4825 = vmatprep.mubr.msk.f32.mxu0 %vm209_vm1, %v5853_v59 }
  0x96   : > { %4600 = vmatmul.mubr.msk.f32.gmra.mrb[28].mxu1 %vm209_vm1, %v5957_v39  ;;  %4826 = vmatmul.mubr.msk.f32.gmra.mrb[12].mxu0 %vm209_vm1, %v5864_v33  ;;  %v860_v33 = vld [vmem:[%s5412_s5 + $0xa] sm:$0xff] }
  0x97   : > { %4602 = vmatprep.mubr.msk.f32.mxu1 %vm209_vm1, %v5960_v35  ;;  %4828 = vmatprep.mubr.msk.f32.mxu0 %vm209_vm1, %v5867_v29 }
  0x9a   : > { %4603 = vmatmul.mubr.msk.f32.gmra.mrb[30].mxu1 %vm209_vm1, %v5971_v62  ;;  %4829 = vmatmul.mubr.msk.f32.gmra.mrb[14].mxu0 %vm209_vm1, %v5883_v31 }
  0x9b   : > { %4607 = vmatprep.mubr.msk.f32.mxu1 %vm209_vm1, %v859_v3  ;;  %4831 = vmatprep.mubr.msk.f32.mxu0 %vm209_vm1, %v5888_v0  ;;  %v6503_v3 = vld [vmem:[#allocation25_spill] sm:$0xff] }
  0x9e   : > { %4608 = vmatmul.mubr.msk.f32.vlgmr.msra.gmra.mrb[0].mxu1 %vm209_vm1, %v860_v33  ;;  %4832 = vmatmul.mubr.msk.f32.gmra.mrb[16].mxu0 %vm209_vm1, %v5901_v28  ;;  %v4034_v33 = vld [vmem:[%s5412_s5 + $0x198] sm:$0xff] }
  0x9f   : > { %4656 = vmatpush3.msk.msra.mxu1 %vm306_vm0, %v5713_v61  ;;  %4610 = vmatprep.mubr.msk.f32.mxu1 %vm209_vm1, %v5528_v24  ;;  %v6026_v24 = vld [vmem:[%s5412_s5 + $0x180] sm:$0xff] }
  0xa0   : > { %4834 = vmatprep.mubr.msk.f32.mxu0 %vm209_vm1, %v5904_v5  ;;  %4955 = vmatprep.subr.msk.mxu1 %vm306_vm0, %v5391_v1  ;;  %v4035_v61 = vld [vmem:[%s5412_s5 + $0x1a0] sm:$0xff] }
  0xa2   : > { %4611 = vmatmul.mubr.msk.f32.gmra.mrb[2].mxu1 %vm209_vm1, %v5539_v25  ;;  %4835 = vmatmul.mubr.msk.f32.gmra.mrb[18].mxu0 %vm209_vm1, %v5915_v7  ;;  %v6037_v25 = vld [vmem:[%s5412_s5 + $0x188] sm:$0xff] }
  0xa3   : > { %4613 = vmatprep.mubr.msk.f32.mxu1 %vm209_vm1, %v5545_v27  ;;  %4837 = vmatprep.mubr.msk.f32.mxu0 %vm209_vm1, %v5918_v10 }
  0xa6   : > { %4614 = vmatmul.mubr.msk.f32.gmra.mrb[4].mxu1 %vm209_vm1, %v5563_v30  ;;  %4838 = vmatmul.mubr.msk.f32.gmra.mrb[20].mxu0 %vm209_vm1, %v5929_v57 }
  0xa7   : > { %4616 = vmatprep.mubr.msk.f32.mxu1 %vm209_vm1, %v5571_v32  ;;  %4840 = vmatprep.mubr.msk.f32.mxu0 %vm209_vm1, %v5932_v51 }
  0xaa   : > { %4617 = vmatmul.mubr.msk.f32.gmra.mrb[6].mxu1 %vm209_vm1, %v5587_v34  ;;  %4841 = vmatmul.mubr.msk.f32.gmra.mrb[22].mxu0 %vm209_vm1, %v5943_v47 }
  0xab   : > { %4619 = vmatprep.mubr.msk.f32.mxu1 %vm209_vm1, %v5593_v36  ;;  %4843 = vmatprep.mubr.msk.f32.mxu0 %vm209_vm1, %v5946_v43 }
  0xae   : > { %4620 = vmatmul.mubr.msk.f32.gmra.mrb[8].mxu1 %vm209_vm1, %v5607_v38  ;;  %4844 = vmatmul.mubr.msk.f32.gmra.mrb[24].mxu0 %vm209_vm1, %v5957_v39 }
  0xaf   : > { %4622 = vmatprep.mubr.msk.f32.mxu1 %vm209_vm1, %v5613_v40  ;;  %4846 = vmatprep.mubr.msk.f32.mxu0 %vm209_vm1, %v5960_v35 }
  0xb2   : > { %4623 = vmatmul.mubr.msk.f32.gmra.mrb[10].mxu1 %vm209_vm1, %v5627_v42  ;;  %4847 = vmatmul.mubr.msk.f32.gmra.mrb[26].mxu0 %vm209_vm1, %v5971_v62 }
  0xb3   : > { %4625 = vmatprep.mubr.msk.f32.mxu1 %vm209_vm1, %v5633_v44  ;;  %4849 = vmatprep.mubr.msk.f32.mxu0 %vm209_vm1, %v6026_v24 }
  0xb6   : > { %4626 = vmatmul.mubr.msk.f32.gmra.mrb[12].mxu1 %vm209_vm1, %v5647_v46  ;;  %4850 = vmatmul.mubr.msk.f32.gmra.mrb[28].mxu0 %vm209_vm1, %v6037_v25 }
  0xb7   : > { %4628 = vmatprep.mubr.msk.f32.mxu1 %vm209_vm1, %v5653_v48  ;;  %4852 = vmatprep.mubr.msk.f32.mxu0 %vm209_vm1, %v4034_v33  ;;  %v6504_v33 = vld [vmem:[#allocation13_spill] sm:$0xff] }
  0xba   : > { %4629 = vmatmul.mubr.msk.f32.gmra.mrb[14].mxu1 %vm209_vm1, %v5667_v50  ;;  %4853 = vmatmul.mubr.msk.f32.gmra.mrb[30].mxu0 %vm209_vm1, %v4035_v61  ;;  %v6505_v61 = vld [vmem:[#allocation26_spill] sm:$0xff] }
  0xbb   : > { %4631 = vmatprep.mubr.msk.f32.mxu1 %vm209_vm1, %v5673_v52  ;;  %4857 = vmatprep.mubr.msk.f32.mxu0 %vm209_vm1, %v5421_v8  ;;  %v6487_v8 = vld [vmem:[#allocation30_spill] sm:$0xff] }
  0xbe   : > { %4632 = vmatmul.mubr.msk.f32.gmra.mrb[16].mxu1 %vm209_vm1, %v5687_v54  ;;  %4858 = vmatmul.mubr.msk.f32.vlgmr.msra.gmra.mrb[0].mxu0 %vm209_vm1, %v5436_v11  ;;  %v6488_v11 = vld [vmem:[#allocation5_spill] sm:$0xff] }
  0xbf   : > { %4906 = vmatpush3.msk.msra.mxu0 %vm306_vm0, %v5872_v37  ;;  %4634 = vmatprep.mubr.msk.f32.mxu1 %vm209_vm1, %v5691_v56  ;;  %v6502_v37 = vld [vmem:[#allocation12_spill] sm:$0xff] }
  0xc0   : > { %4860 = vmatprep.mubr.msk.f32.mxu0 %vm209_vm1, %v5442_v12  ;;  %v6489_v12 = vld [vmem:[#allocation18_spill] sm:$0xff] }
  0xc2   : > { %4635 = vmatmul.mubr.msk.f32.gmra.mrb[18].mxu1 %vm209_vm1, %v5702_v58  ;;  %4861 = vmatmul.mubr.msk.f32.gmra.mrb[2].mxu0 %vm209_vm1, %v5455_v13  ;;  %v6490_v13 = vld [vmem:[#allocation6_spill] sm:$0xff] }
  0xc3   : > { %4637 = vmatprep.mubr.msk.f32.mxu1 %vm209_vm1, %v5708_v60  ;;  %4863 = vmatprep.mubr.msk.f32.mxu0 %vm209_vm1, %v5458_v14  ;;  %v6491_v14 = vld [vmem:[#allocation19_spill] sm:$0xff] }
  0xc6   : > { %4638 = vmatmul.mubr.msk.f32.gmra.mrb[20].mxu1 %vm209_vm1, %v5726_v63  ;;  %4864 = vmatmul.mubr.msk.f32.gmra.mrb[4].mxu0 %vm209_vm1, %v5469_v15  ;;  %v6492_v15 = vld [vmem:[#allocation7_spill] sm:$0xff] }
  0xc7   : > { %4640 = vmatprep.mubr.msk.f32.mxu1 %vm209_vm1, %v5734_v2  ;;  %4866 = vmatprep.mubr.msk.f32.mxu0 %vm209_vm1, %v5472_v16  ;;  %v6493_v16 = vld [vmem:[#allocation20_spill] sm:$0xff] }
  0xca   : > { %4641 = vmatmul.mubr.msk.f32.gmra.mrb[22].mxu1 %vm209_vm1, %v5750_v4  ;;  %4867 = vmatmul.mubr.msk.f32.gmra.mrb[6].mxu0 %vm209_vm1, %v5483_v17  ;;  %v6494_v17 = vld [vmem:[#allocation8_spill] sm:$0xff] }
  0xcb   : > { %4643 = vmatprep.mubr.msk.f32.mxu1 %vm209_vm1, %v5756_v6  ;;  %4869 = vmatprep.mubr.msk.f32.mxu0 %vm209_vm1, %v5486_v18  ;;  %v6495_v18 = vld [vmem:[#allocation21_spill] sm:$0xff] }
  0xce   : > { %4644 = vmatmul.mubr.msk.f32.gmra.mrb[24].mxu1 %vm209_vm1, %v5770_v9  ;;  %4870 = vmatmul.mubr.msk.f32.gmra.mrb[8].mxu0 %vm209_vm1, %v5497_v19  ;;  %v6496_v19 = vld [vmem:[#allocation9_spill] sm:$0xff] }
  0xcf   : > { %4646 = vmatprep.mubr.msk.f32.mxu1 %vm209_vm1, %v5776_v55  ;;  %4872 = vmatprep.mubr.msk.f32.mxu0 %vm209_vm1, %v5500_v20  ;;  %v6497_v20 = vld [vmem:[#allocation22_spill] sm:$0xff] }
  0xd2   : > { %4647 = vmatmul.mubr.msk.f32.gmra.mrb[26].mxu1 %vm209_vm1, %v5790_v53  ;;  %4873 = vmatmul.mubr.msk.f32.gmra.mrb[10].mxu0 %vm209_vm1, %v5511_v21  ;;  %v6498_v21 = vld [vmem:[#allocation10_spill] sm:$0xff] }
  0xd3   : > { %4649 = vmatprep.mubr.msk.f32.mxu1 %vm209_vm1, %v5796_v49  ;;  %4875 = vmatprep.mubr.msk.f32.mxu0 %vm209_vm1, %v5514_v22  ;;  %v6500_v22 = vld [vmem:[#allocation11_spill] sm:$0xff] }
  0xd6   : > { %4650 = vmatmul.mubr.msk.f32.gmra.mrb[28].mxu1 %vm209_vm1, %v5810_v45  ;;  %4876 = vmatmul.mubr.msk.f32.gmra.mrb[12].mxu0 %vm209_vm1, %v5525_v23  ;;  %v6501_v23 = vld [vmem:[#allocation24_spill] sm:$0xff] }
  0xd7   : > { %4652 = vmatprep.mubr.msk.f32.mxu1 %vm209_vm1, %v5816_v41  ;;  %4878 = vmatprep.mubr.msk.f32.mxu0 %vm209_vm1, %v5542_v26 }
  0xda   : > { %4653 = vmatmul.mubr.msk.f32.gmra.mrb[30].mxu1 %vm209_vm1, %v6487_v8  ;;  %4879 = vmatmul.mubr.msk.f32.gmra.mrb[14].mxu0 %vm209_vm1, %v6488_v11  ;;  %v6514_v8 = vld [vmem:[#allocation33_spill] sm:$0xff] }
  0xdb   : > { %4657 = vmatprep.mubr.msk.f32.mxu1 %vm209_vm1, %v6489_v12  ;;  %4881 = vmatprep.mubr.msk.f32.mxu0 %vm209_vm1, %v6490_v13  ;;  %v6506_v12 = vld [vmem:[#allocation14_spill] sm:$0xff] }
  0xde   : > { %4658 = vmatmul.mubr.msk.f32.vlgmr.msra.gmra.mrb[0].mxu1 %vm209_vm1, %v6491_v14  ;;  %4882 = vmatmul.mubr.msk.f32.gmra.mrb[16].mxu0 %vm209_vm1, %v6492_v15  ;;  %v6507_v14 = vld [vmem:[#allocation27_spill] sm:$0xff] }
  0xdf   : > { %4956 = vmatpush3.msk.msra.mxu1 %vm306_vm0, %v5391_v1  ;;  %4660 = vmatprep.mubr.msk.f32.mxu1 %vm209_vm1, %v6493_v16  ;;  %v6499_v1 = vld [vmem:[#allocation23_spill] sm:$0xff] }
  0xe0   : > { %4884 = vmatprep.mubr.msk.f32.mxu0 %vm209_vm1, %v6494_v17  ;;  %v6508_v16 = vld [vmem:[#allocation15_spill] sm:$0xff] }
  0xe2   : > { %4661 = vmatmul.mubr.msk.f32.gmra.mrb[2].mxu1 %vm209_vm1, %v6495_v18  ;;  %4885 = vmatmul.mubr.msk.f32.gmra.mrb[18].mxu0 %vm209_vm1, %v6496_v19  ;;  %v6509_v18 = vld [vmem:[#allocation28_spill] sm:$0xff] }
  0xe3   : > { %4663 = vmatprep.mubr.msk.f32.mxu1 %vm209_vm1, %v6497_v20  ;;  %4887 = vmatprep.mubr.msk.f32.mxu0 %vm209_vm1, %v6498_v21  ;;  %v6510_v20 = vld [vmem:[#allocation16_spill] sm:$0xff] }
  0xe6   : > { %4664 = vmatmul.mubr.msk.f32.gmra.mrb[4].mxu1 %vm209_vm1, %v6499_v1  ;;  %4888 = vmatmul.mubr.msk.f32.gmra.mrb[20].mxu0 %vm209_vm1, %v6500_v22  ;;  %v6164_v1 = vld [vmem:[%s5412_s5 + $0x181] sm:$0xff] }
  0xe7   : > { %4666 = vmatprep.mubr.msk.f32.mxu1 %vm209_vm1, %v6501_v23  ;;  %4890 = vmatprep.mubr.msk.f32.mxu0 %vm209_vm1, %v6502_v37  ;;  %v6511_v23 = vld [vmem:[#allocation29_spill] sm:$0xff] }
  0xea   : > { %4667 = vmatmul.mubr.msk.f32.gmra.mrb[6].mxu1 %vm209_vm1, %v6503_v3  ;;  %4891 = vmatmul.mubr.msk.f32.gmra.mrb[22].mxu0 %vm209_vm1, %v6504_v33  ;;  %v6512_v3 = vld [vmem:[#allocation17_spill] sm:$0xff] }
  0xeb   : > { %4669 = vmatprep.mubr.msk.f32.mxu1 %vm209_vm1, %v6505_v61  ;;  %4893 = vmatprep.mubr.msk.f32.mxu0 %vm209_vm1, %v6506_v12  ;;  %v6513_v61 = vld [vmem:[#allocation31_spill] sm:$0xff] }
  0xee   : > { %4670 = vmatmul.mubr.msk.f32.gmra.mrb[8].mxu1 %vm209_vm1, %v6507_v14  ;;  %4894 = vmatmul.mubr.msk.f32.gmra.mrb[24].mxu0 %vm209_vm1, %v6508_v16  ;;  %v6175_v14 = vld [vmem:[%s5412_s5 + $0x189] sm:$0xff] }
  0xef   : > { %4672 = vmatprep.mubr.msk.f32.mxu1 %vm209_vm1, %v6509_v18  ;;  %4896 = vmatprep.mubr.msk.f32.mxu0 %vm209_vm1, %v6510_v20  ;;  %v4100_v18 = vld [vmem:[%s5412_s5 + $0x199] sm:$0xff] }
  0xf2   : > { %4673 = vmatmul.mubr.msk.f32.gmra.mrb[10].mxu1 %vm209_vm1, %v6511_v23  ;;  %4897 = vmatmul.mubr.msk.f32.gmra.mrb[26].mxu0 %vm209_vm1, %v6512_v3  ;;  %v4101_v23 = vld [vmem:[%s5412_s5 + $0x1a1] sm:$0xff]  ;;  %v6515_v3 = vld [vmem:[#allocation35_spill] sm:$0xff] }
  0xf3   : > { %4675 = vmatprep.mubr.msk.f32.mxu1 %vm209_vm1, %v6513_v61  ;;  %4899 = vmatprep.mubr.msk.f32.mxu0 %vm209_vm1, %v6164_v1 }
  0xf6   : > { %4676 = vmatmul.mubr.msk.f32.gmra.mrb[12].mxu1 %vm209_vm1, %v6514_v8  ;;  %4900 = vmatmul.mubr.msk.f32.gmra.mrb[28].mxu0 %vm209_vm1, %v6175_v14 }
  0xf7   : > { %4678 = vmatprep.mubr.msk.f32.mxu1 %vm209_vm1, %v5853_v59  ;;  %4902 = vmatprep.mubr.msk.f32.mxu0 %vm209_vm1, %v4100_v18 }
  0xfa   : > { %4679 = vmatmul.mubr.msk.f32.gmra.mrb[14].mxu1 %vm209_vm1, %v6515_v3  ;;  %4903 = vmatmul.mubr.msk.f32.gmra.mrb[30].mxu0 %vm209_vm1, %v4101_v23 }
  0xfb   : > { %4681 = vmatprep.mubr.msk.f32.mxu1 %vm209_vm1, %v5867_v29  ;;  %4907 = vmatprep.mubr.msk.f32.mxu0 %vm209_vm1, %v5545_v27  ;;  %v6517_v27 = vld [vmem:[#allocation32_spill] sm:$0xff] }
  0xfc   : > { %v4166_v29 = vld [vmem:[%s5412_s5 + $0x19a] sm:$0xff] }
  0xfe   : > { %4682 = vmatmul.mubr.msk.f32.gmra.mrb[16].mxu1 %vm209_vm1, %v5883_v31  ;;  %4908 = vmatmul.mubr.msk.f32.vlgmr.msra.gmra.mrb[0].mxu0 %vm209_vm1, %v5563_v30  ;;  %v6518_v30 = vld [vmem:[#allocation17_spill] sm:$0xff]  ;;  %v6519_v31 = vld [vmem:[#allocation34_spill] sm:$0xff] }
  0xff   : > { %4684 = vmatprep.mubr.msk.f32.mxu1 %vm209_vm1, %v5888_v0  ;;  %4910 = vmatprep.mubr.msk.f32.mxu0 %vm209_vm1, %v5571_v32  ;;  %v4167_v32 = vld [vmem:[%s5412_s5 + $0x1a2] sm:$0xff]  ;;  %s5255_s5 = scalar_lea.vmem %s6359_s29, 4096 }
 0x100   : > { %p5256_p11 = scmp.ne.s32.totalorder %s6359_s29, %s5255_s5  ;;  %p5263_p1 = scmp.lt.s32.totalorder %s5261_s8, %s5255_s5 }
 0x102   : > { %4685 = vmatmul.mubr.msk.f32.gmra.mrb[18].mxu1 %vm209_vm1, %v5901_v28  ;;  %4911 = vmatmul.mubr.msk.f32.gmra.mrb[2].mxu0 %vm209_vm1, %v5587_v34  ;;  %p5257_p12 = pnand %p5256_p11, %p5375_p5  ;;  %p5264_p2 = por %p5263_p1, %p5262_p0 }
 0x103   : > { %4687 = vmatprep.mubr.msk.f32.mxu1 %vm209_vm1, %v5904_v5  ;;  %4913 = vmatprep.mubr.msk.f32.mxu0 %vm209_vm1, %v5593_v36 }
 0x104   : > { %p5258_p13 = pneg %p5257_p12 }
 0x106   : > { %4688 = vmatmul.mubr.msk.f32.gmra.mrb[20].mxu1 %vm209_vm1, %v5915_v7  ;;  %4914 = vmatmul.mubr.msk.f32.gmra.mrb[4].mxu0 %vm209_vm1, %v5607_v38  ;;  %p5265_p3 = pnand %p5264_p2, %p5258_p13 }
 0x107   : > { %4690 = vmatprep.mubr.msk.f32.mxu1 %vm209_vm1, %v5918_v10  ;;  %4916 = vmatprep.mubr.msk.f32.mxu0 %vm209_vm1, %v5613_v40 }
 0x10a   : > { %4691 = vmatmul.mubr.msk.f32.gmra.mrb[22].mxu1 %vm209_vm1, %v5929_v57  ;;  %4917 = vmatmul.mubr.msk.f32.gmra.mrb[6].mxu0 %vm209_vm1, %v5627_v42 }
 0x10b   : > { %4693 = vmatprep.mubr.msk.f32.mxu1 %vm209_vm1, %v5932_v51  ;;  %4919 = vmatprep.mubr.msk.f32.mxu0 %vm209_vm1, %v5633_v44 }
 0x10e   : > { %4694 = vmatmul.mubr.msk.f32.gmra.mrb[24].mxu1 %vm209_vm1, %v5943_v47  ;;  %4920 = vmatmul.mubr.msk.f32.gmra.mrb[8].mxu0 %vm209_vm1, %v5647_v46 }
 0x10f   : > { %4696 = vmatprep.mubr.msk.f32.mxu1 %vm209_vm1, %v5946_v43  ;;  %4922 = vmatprep.mubr.msk.f32.mxu0 %vm209_vm1, %v5653_v48 }
 0x112   : > { %4697 = vmatmul.mubr.msk.f32.gmra.mrb[26].mxu1 %vm209_vm1, %v5957_v39  ;;  %4923 = vmatmul.mubr.msk.f32.gmra.mrb[10].mxu0 %vm209_vm1, %v5667_v50 }
 0x113   : > { %4699 = vmatprep.mubr.msk.f32.mxu1 %vm209_vm1, %v5960_v35  ;;  %4925 = vmatprep.mubr.msk.f32.mxu0 %vm209_vm1, %v5673_v52 }
 0x116   : > { %4700 = vmatmul.mubr.msk.f32.gmra.mrb[28].mxu1 %vm209_vm1, %v5971_v62  ;;  %4926 = vmatmul.mubr.msk.f32.gmra.mrb[12].mxu0 %vm209_vm1, %v5687_v54 }
 0x117   : > { %4702 = vmatprep.mubr.msk.f32.mxu1 %vm209_vm1, %v6026_v24  ;;  %4928 = vmatprep.mubr.msk.f32.mxu0 %vm209_vm1, %v5691_v56 }
 0x11a   : > { %4703 = vmatmul.mubr.msk.f32.gmra.mrb[30].mxu1 %vm209_vm1, %v6037_v25  ;;  %4929 = vmatmul.mubr.msk.f32.gmra.mrb[14].mxu0 %vm209_vm1, %v5702_v58 }
 0x11b   : > { %4731 = vmatprep.mubr.msk.f32.mxu1 %vm209_vm1, %v5542_v26  ;;  %4931 = vmatprep.mubr.msk.f32.mxu0 %vm209_vm1, %v5708_v60  ;;  %v6516_v26 = vld [vmem:[#allocation30_spill] sm:$0xff] }
 0x11e   : > { %4732 = vmatmul.mubr.msk.f32.vlgmr.msra.gmra.mrb[16].mxu1 %vm209_vm1, %v6488_v11  ;;  %4932 = vmatmul.mubr.msk.f32.gmra.mrb[16].mxu0 %vm209_vm1, %v5726_v63 }
 0x11f   : > { %4734 = vmatprep.mubr.msk.f32.mxu1 %vm209_vm1, %v6490_v13  ;;  %4934 = vmatprep.mubr.msk.f32.mxu0 %vm209_vm1, %v5734_v2 }
 0x122   : > { %4735 = vmatmul.mubr.msk.f32.gmra.mrb[18].mxu1 %vm209_vm1, %v6492_v15  ;;  %4935 = vmatmul.mubr.msk.f32.gmra.mrb[18].mxu0 %vm209_vm1, %v5750_v4 }
 0x123   : > { %4737 = vmatprep.mubr.msk.f32.mxu1 %vm209_vm1, %v6494_v17  ;;  %4937 = vmatprep.mubr.msk.f32.mxu0 %vm209_vm1, %v5756_v6 }
 0x126   : > { %4738 = vmatmul.mubr.msk.f32.gmra.mrb[20].mxu1 %vm209_vm1, %v6496_v19  ;;  %4938 = vmatmul.mubr.msk.f32.gmra.mrb[20].mxu0 %vm209_vm1, %v5770_v9 }
 0x127   : > { %4740 = vmatprep.mubr.msk.f32.mxu1 %vm209_vm1, %v6498_v21  ;;  %4940 = vmatprep.mubr.msk.f32.mxu0 %vm209_vm1, %v5776_v55 }
 0x12a   : > { %4741 = vmatmul.mubr.msk.f32.gmra.mrb[22].mxu1 %vm209_vm1, %v6500_v22  ;;  %4941 = vmatmul.mubr.msk.f32.gmra.mrb[22].mxu0 %vm209_vm1, %v5790_v53 }
 0x12b   : > { %4743 = vmatprep.mubr.msk.f32.mxu1 %vm209_vm1, %v6502_v37  ;;  %4943 = vmatprep.mubr.msk.f32.mxu0 %vm209_vm1, %v5796_v49 }
 0x12e   : > { %4744 = vmatmul.mubr.msk.f32.gmra.mrb[24].mxu1 %vm209_vm1, %v6504_v33  ;;  %4944 = vmatmul.mubr.msk.f32.gmra.mrb[24].mxu0 %vm209_vm1, %v5810_v45 }
 0x12f   : > { %4746 = vmatprep.mubr.msk.f32.mxu1 %vm209_vm1, %v6506_v12  ;;  %4946 = vmatprep.mubr.msk.f32.mxu0 %vm209_vm1, %v5816_v41 }
 0x132   : > { %4747 = vmatmul.mubr.msk.f32.gmra.mrb[26].mxu1 %vm209_vm1, %v6508_v16  ;;  %4947 = vmatmul.mubr.msk.f32.gmra.mrb[26].mxu0 %vm209_vm1, %v6516_v26 }
 0x133   : > { %4749 = vmatprep.mubr.msk.f32.mxu1 %vm209_vm1, %v6510_v20  ;;  %4949 = vmatprep.mubr.msk.f32.mxu0 %vm209_vm1, %v6517_v27 }
 0x136   : > { %4750 = vmatmul.mubr.msk.f32.gmra.mrb[28].mxu1 %vm209_vm1, %v6518_v30  ;;  %4950 = vmatmul.mubr.msk.f32.gmra.mrb[28].mxu0 %vm209_vm1, %v6519_v31 }
 0x137   : > { %4752 = vmatprep.mubr.msk.f32.mxu1 %vm209_vm1, %v6164_v1  ;;  %4952 = vmatprep.mubr.msk.f32.mxu0 %vm209_vm1, %v4166_v29 }
 0x13a   : > { %4753 = vmatmul.mubr.msk.f32.gmra.mrb[30].mxu1 %vm209_vm1, %v6175_v14  ;;  %4953 = vmatmul.mubr.msk.f32.gmra.mrb[30].mxu0 %vm209_vm1, %v4167_v32 }
 0x1b1   : > { %v4659_v34 = vpop.f32.mrb[0].mxu1 }
 0x1b2   : > { %v1449_v35 = vpop.f32.mrb[1].mxu1 }
 0x1b5   : > { %v4662_v36 = vpop.f32.mrb[2].mxu1 }
 0x1b6   : > { %v1459_v38 = vpop.f32.mrb[3].mxu1 }
 0x1b9   : > { %v4665_v39 = vpop.f32.mrb[4].mxu1 }
 0x1ba   : > { %v1469_v40 = vpop.f32.mrb[5].mxu1 }
 0x1bd   : > { %v4668_v41 = vpop.f32.mrb[6].mxu1 }
 0x1be   : > { %v1479_v42 = vpop.f32.mrb[7].mxu1 }
 0x1c1   : > { %v4671_v43 = vpop.f32.mrb[8].mxu1 }
 0x1c2   : > { %v1489_v44 = vpop.f32.mrb[9].mxu1 }
 0x1c5   : > { %v4674_v45 = vpop.f32.mrb[10].mxu1 }
 0x1c6   : > { %v1499_v46 = vpop.f32.mrb[11].mxu1 }
 0x1c9   : > { %v4677_v47 = vpop.f32.mrb[12].mxu1 }
 0x1ca   : > { %v1509_v48 = vpop.f32.mrb[13].mxu1 }
 0x1cd   : > { %v4680_v49 = vpop.f32.mrb[14].mxu1 }
 0x1ce   : > { %v1519_v50 = vpop.f32.mrb[15].mxu1 }
 0x1d1   : > { %v4909_v51 = vpop.f32.mrb[0].mxu0 }
 0x1d2   : > { %v4957_v52 = vadd.f32 %v4909_v51, %v4659_v34  ;;  %v3400_v53 = vpop.f32.mrb[1].mxu0 }
 0x1d3   : > { %v4958_v54 = vadd.f32 %v3400_v53, %v1449_v35 }
 0x1d4   : > { %3592 = vst [vmem:[%s6320_s27 + $0x8] sm:$0xff] %v4957_v52 }
 0x1d5   : > { %3591 = vst [vmem:[%s6320_s27] sm:$0xff] %v4958_v54  ;;  %v4912_v56 = vpop.f32.mrb[2].mxu0 }
 0x1d6   : > { %v4959_v58 = vadd.f32 %v4912_v56, %v4662_v36  ;;  %v3410_v59 = vpop.f32.mrb[3].mxu0 }
 0x1d7   : > { %v4960_v60 = vadd.f32 %v3410_v59, %v1459_v38 }
 0x1d8   : > { %3594 = vst [vmem:[%s6320_s27 + $0x18] sm:$0xff] %v4959_v58 }
 0x1d9   : > { %3593 = vst [vmem:[%s6320_s27 + $0x10] sm:$0xff] %v4960_v60  ;;  %v4915_v62 = vpop.f32.mrb[4].mxu0 }
 0x1da   : > { %v4961_v63 = vadd.f32 %v4915_v62, %v4665_v39  ;;  %v3420_v0 = vpop.f32.mrb[5].mxu0 }
 0x1db   : > { %v4962_v2 = vadd.f32 %v3420_v0, %v1469_v40 }
 0x1dc   : > { %3596 = vst [vmem:[%s6320_s27 + $0x28] sm:$0xff] %v4961_v63 }
 0x1dd   : > { %3595 = vst [vmem:[%s6320_s27 + $0x20] sm:$0xff] %v4962_v2  ;;  %v4918_v4 = vpop.f32.mrb[6].mxu0 }
 0x1de   : > { %v4963_v5 = vadd.f32 %v4918_v4, %v4668_v41  ;;  %v3430_v6 = vpop.f32.mrb[7].mxu0 }
 0x1df   : > { %v4964_v7 = vadd.f32 %v3430_v6, %v1479_v42 }
 0x1e0   : > { %3598 = vst [vmem:[%s6320_s27 + $0x38] sm:$0xff] %v4963_v5 }
 0x1e1   : > { %3597 = vst [vmem:[%s6320_s27 + $0x30] sm:$0xff] %v4964_v7  ;;  %v4921_v9 = vpop.f32.mrb[8].mxu0 }
 0x1e2   : > { %v4965_v10 = vadd.f32 %v4921_v9, %v4671_v43  ;;  %v3440_v55 = vpop.f32.mrb[9].mxu0 }
 0x1e3   : > { %v4966_v57 = vadd.f32 %v3440_v55, %v1489_v44 }
 0x1e4   : > { %3600 = vst [vmem:[%s6320_s27 + $0x48] sm:$0xff] %v4965_v10 }
 0x1e5   : > { %3599 = vst [vmem:[%s6320_s27 + $0x40] sm:$0xff] %v4966_v57  ;;  %v4924_v28 = vpop.f32.mrb[10].mxu0 }
 0x1e6   : > { %v4967_v24 = vadd.f32 %v4924_v28, %v4674_v45  ;;  %v3450_v25 = vpop.f32.mrb[11].mxu0 }
 0x1e7   : > { %v4968_v8 = vadd.f32 %v3450_v25, %v1499_v46 }
 0x1e8   : > { %3602 = vst [vmem:[%s6320_s27 + $0x58] sm:$0xff] %v4967_v24 }
 0x1e9   : > { %3601 = vst [vmem:[%s6320_s27 + $0x50] sm:$0xff] %v4968_v8  ;;  %v4927_v11 = vpop.f32.mrb[12].mxu0 }
 0x1ea   : > { %v4969_v13 = vadd.f32 %v4927_v11, %v4677_v47  ;;  %v3460_v15 = vpop.f32.mrb[13].mxu0 }
 0x1eb   : > { %v4970_v17 = vadd.f32 %v3460_v15, %v1509_v48 }
 0x1ec   : > { %3604 = vst [vmem:[%s6320_s27 + $0x68] sm:$0xff] %v4969_v13 }
 0x1ed   : > { %3603 = vst [vmem:[%s6320_s27 + $0x60] sm:$0xff] %v4970_v17  ;;  %v4930_v19 = vpop.f32.mrb[14].mxu0 }
 0x1ee   : > { %v4971_v21 = vadd.f32 %v4930_v19, %v4680_v49  ;;  %v3470_v22 = vpop.f32.mrb[15].mxu0 }
 0x1ef   : > { %v4972_v37 = vadd.f32 %v3470_v22, %v1519_v50 }
 0x1f0   : > { %3606 = vst [vmem:[%s6320_s27 + $0x78] sm:$0xff] %v4971_v21 }
 0x1f1   : > { %3605 = vst [vmem:[%s6320_s27 + $0x70] sm:$0xff] %v4972_v37  ;;  %v4733_v33 = vpop.f32.mrb[16].mxu1  ;;  %v4933_v12 = vpop.f32.mrb[16].mxu0 }
 0x1f2   : > { %v4973_v16 = vadd.f32 %v4933_v12, %v4733_v33  ;;  %v1919_v20 = vpop.f32.mrb[17].mxu1  ;;  %v3480_v1 = vpop.f32.mrb[17].mxu0 }
 0x1f3   : > { %v4974_v3 = vadd.f32 %v3480_v1, %v1919_v20 }
 0x1f4   : > { %3608 = vst [vmem:[%s6320_s27 + $0x88] sm:$0xff] %v4973_v16 }
 0x1f5   : > { %3607 = vst [vmem:[%s6320_s27 + $0x80] sm:$0xff] %v4974_v3  ;;  %v4736_v61 = vpop.f32.mrb[18].mxu1  ;;  %v4936_v14 = vpop.f32.mrb[18].mxu0 }
 0x1f6   : > { %v4975_v18 = vadd.f32 %v4936_v14, %v4736_v61  ;;  %v1929_v23 = vpop.f32.mrb[19].mxu1  ;;  %v3490_v26 = vpop.f32.mrb[19].mxu0 }
 0x1f7   : > { %v4976_v27 = vadd.f32 %v3490_v26, %v1929_v23 }
 0x1f8   : > { %3610 = vst [vmem:[%s6320_s27 + $0x98] sm:$0xff] %v4975_v18 }
 0x1f9   : > { %3609 = vst [vmem:[%s6320_s27 + $0x90] sm:$0xff] %v4976_v27  ;;  %v4739_v29 = vpop.f32.mrb[20].mxu1  ;;  %v4939_v30 = vpop.f32.mrb[20].mxu0 }
 0x1fa   : > { %v4977_v31 = vadd.f32 %v4939_v30, %v4739_v29  ;;  %v1939_v32 = vpop.f32.mrb[21].mxu1  ;;  %v3500_v34 = vpop.f32.mrb[21].mxu0 }
 0x1fb   : > { %v4978_v35 = vadd.f32 %v3500_v34, %v1939_v32 }
 0x1fc   : > { %3612 = vst [vmem:[%s6320_s27 + $0xa8] sm:$0xff] %v4977_v31 }
 0x1fd   : > { %3611 = vst [vmem:[%s6320_s27 + $0xa0] sm:$0xff] %v4978_v35  ;;  %v4742_v36 = vpop.f32.mrb[22].mxu1  ;;  %v4942_v38 = vpop.f32.mrb[22].mxu0 }
 0x1fe   : > { %v4979_v39 = vadd.f32 %v4942_v38, %v4742_v36  ;;  %v1949_v40 = vpop.f32.mrb[23].mxu1  ;;  %v3510_v41 = vpop.f32.mrb[23].mxu0 }
 0x1ff   : > { %v4980_v42 = vadd.f32 %v3510_v41, %v1949_v40 }
 0x200   : > { %3614 = vst [vmem:[%s6320_s27 + $0xb8] sm:$0xff] %v4979_v39 }
 0x201   : > { %3613 = vst [vmem:[%s6320_s27 + $0xb0] sm:$0xff] %v4980_v42  ;;  %v4745_v43 = vpop.f32.mrb[24].mxu1  ;;  %v4945_v44 = vpop.f32.mrb[24].mxu0 }
 0x202   : > { %v4981_v45 = vadd.f32 %v4945_v44, %v4745_v43  ;;  %v1959_v46 = vpop.f32.mrb[25].mxu1  ;;  %v3520_v47 = vpop.f32.mrb[25].mxu0 }
 0x203   : > { %v4982_v48 = vadd.f32 %v3520_v47, %v1959_v46 }
 0x204   : > { %3616 = vst [vmem:[%s6320_s27 + $0xc8] sm:$0xff] %v4981_v45 }
 0x205   : > { %3615 = vst [vmem:[%s6320_s27 + $0xc0] sm:$0xff] %v4982_v48  ;;  %v4748_v49 = vpop.f32.mrb[26].mxu1  ;;  %v4948_v50 = vpop.f32.mrb[26].mxu0 }
 0x206   : > { %v4983_v51 = vadd.f32 %v4948_v50, %v4748_v49  ;;  %v1969_v52 = vpop.f32.mrb[27].mxu1  ;;  %v3530_v53 = vpop.f32.mrb[27].mxu0 }
 0x207   : > { %v4984_v54 = vadd.f32 %v3530_v53, %v1969_v52 }
 0x208   : > { %3618 = vst [vmem:[%s6320_s27 + $0xd8] sm:$0xff] %v4983_v51 }
 0x209   : > { %3617 = vst [vmem:[%s6320_s27 + $0xd0] sm:$0xff] %v4984_v54  ;;  %v4751_v56 = vpop.f32.mrb[28].mxu1  ;;  %v4951_v58 = vpop.f32.mrb[28].mxu0 }
 0x20a   : > { %v4985_v59 = vadd.f32 %v4951_v58, %v4751_v56  ;;  %v1979_v60 = vpop.f32.mrb[29].mxu1  ;;  %v3540_v62 = vpop.f32.mrb[29].mxu0 }
 0x20b   : > { %v4986_v63 = vadd.f32 %v3540_v62, %v1979_v60 }
 0x20c   : > { %3620 = vst [vmem:[%s6320_s27 + $0xe8] sm:$0xff] %v4985_v59 }
 0x20d   : > { %3619 = vst [vmem:[%s6320_s27 + $0xe0] sm:$0xff] %v4986_v63  ;;  %v4754_v0 = vpop.f32.mrb[30].mxu1  ;;  %v4954_v2 = vpop.f32.mrb[30].mxu0 }
 0x20e   : > { %v4987_v4 = vadd.f32 %v4954_v2, %v4754_v0  ;;  %v1989_v5 = vpop.f32.mrb[31].mxu1  ;;  %v3550_v6 = vpop.f32.mrb[31].mxu0 }
 0x20f   : > { %v4988_v7 = vadd.f32 %v3550_v6, %v1989_v5 }
 0x210   : > { %3622 = vst [vmem:[%s6320_s27 + $0xf8] sm:$0xff] %v4987_v4 }
 0x211   : > { %3621 = vst [vmem:[%s6320_s27 + $0xf0] sm:$0xff] %v4988_v7 }
 0x212   : > { %5268 = shalt.err (!%p5265_p3)
}
 0x213   : > { %s5269_s14 = scalar_lea.hbm %s6357_s4, 4096  ;;  %s5273_s21 = scalar_lea.hbm %s6408_s2, 8192 }
 0x214   : > { %p5270_p4 = scmp.ne.s32.totalorder %s6357_s4, %s5269_s14  ;;  %p5274_p9 = scmp.lt.u32.totalorder %s6357_s4, %s6408_s2 }
 0x215   : > { %p5275_p10 = scmp.lt.u32.totalorder %s5273_s21, %s5269_s14  ;;  %p5277_p12 = scmp.lt.u32.totalorder %s5269_s14, %s6357_s4 }
 0x216   : > { %p5271_p7 = pnand %p5270_p4, %p5375_p5 }
 0x217   : > { %p5276_p11 = por %p5275_p10, %p5274_p9 }
 0x218   : > { %p5272_p8 = pneg %p5271_p7 }
 0x219   : > { %p5278_p13 = por %p5277_p12, %p5276_p11 }
 0x21b   : > { %p5279_p0 = pnand %p5278_p13, %p5272_p8 }
 0x21d   : > { %5282 = shalt.err (!%p5279_p0)
}
 0x21e   : > { %s5320_s24 = smov 128   ;;  %s5321_s25 = smov 8  }
 0x21f   : > { %5214 = dma.vmem_to_hbm [thread:$0]  (%p5375_p5), %s6359_s29, 4096, %s6357_s4, %s6365_s13, %s5320_s24, %s5320_s24, %s5321_s25  }
 0x220 PF: > { %p5220_p1 = scmp.ge.s32.totalorder %s5317_s12, 2  ;;  %s3652_s26 = sand.u32 1, %s5305_s9  }
 0x221   : > { %s3653_s27 = scalar_lea.sflag [#allocation3], %s3652_s26 }
 0x222   : > { %p5217_p2 = pnand %p5220_p1, %p5379_p6 }
 0x224   : > { %5300 = dma.done.wait (!%p5217_p2), %s3653_s27, 4096  }
 0x225   : > { %5302 = vsyncadd (!%p5217_p2), %s3653_s27, 4294963200  ;;  %p12_p3 = scmp.ge.s32.totalorder %s5362_s15, 4   ;;  %s6520_s9 = smov %s5309_s10 }
 0x226   : > { %s6521_s10 = smov %s5313_s11  ;;  %s6522_s11 = smov %s5373_s18 }
 0x227   : > { %s6523_s12 = smov %s5362_s15  ;;  %14 = sbr.rel (!%p12_p3) target bundleno = 3 (0x3), region = 73 }
 0x22e   :  { %3658 = vsyncpa [#allocation3], 1 }
 0x22f   :  { %3660 = vsyncpa [#allocation3 + $0x1], 1 }

</bundles_post_ra>
